<compile_context>
chip_gen: v7x
topology: tpu7x:2x2x1
jax: 0.10.0
libtpu: 0.0.40
codegen_flags: <defaults>
</compile_context>

<pallas_src>
import functools

import jax
import jax.numpy as jnp
from jax import lax
from jax.experimental import pallas as pl
from jax.experimental.pallas import tpu as pltpu

EPS = 1e-5
_VMEM_LIMIT = 48 * 1024 * 1024     # fits v7x's 64 MiB physical VMEM with headroom


def _pick_batch_block(n, rows_per_image, target_rows=1024):
    """Images per grid step: prefer >=2 grid steps, cap per-step matmul rows."""
    divisors = [d for d in range(1, n + 1) if n % d == 0]
    cands = [d for d in divisors if n // d >= 2] or divisors
    fit = [d for d in cands if d * rows_per_image <= target_rows]
    return max(fit) if fit else min(cands)


# ----------------------------------------------------------------------------
# Kernel A: conv1 (k x k, stride 2) fused with the 1x1 stride-2 skip conv in a
#           single MXU dot, plus BN1/BN3 sum / sumsq epilogues.
# ----------------------------------------------------------------------------
def _conv_s2_kernel(xph_ref, wf_ref, y1_ref, ys_ref, st_ref, *, kk):
    # xph_ref : (Nb, 4*Hq, Wq, Cin) bf16  stride-2 phase-split, padded input
    # wf_ref  : (kk*kk*Cin, 2*Cout) bf16  conv1 taps | skip (center-tap rows)
    # y1_ref  : (Nb, Ho, Wo, Cout)  bf16  conv1 output (pre-BN)
    # ys_ref  : (Nb, Ho, Wo, Cout)  f32   skip output  (pre-BN)
    # st_ref  : (1, 4, Cout)        f32   [sum1, sumsq1, sum_s, sumsq_s]
    nb, ho, wo, cout = y1_ref.shape
    cin = xph_ref.shape[3]
    hq = xph_ref.shape[1] // 4

    x = xph_ref[...].astype(jnp.float32)                     # small; safe concat dtype

    taps = []
    for ki in range(kk):
        for kj in range(kk):
            q = (ki % 2) * 2 + (kj % 2)                      # stride-2 phase of tap
            di, dj = ki // 2, kj // 2                        # offset inside the phase
            taps.append(x[:, q * hq + di: q * hq + di + ho, dj: dj + wo, :])
    patches = jnp.concatenate(taps, axis=-1)                 # (Nb, Ho, Wo, kk*kk*Cin)
    patches = patches.reshape(nb * ho * wo, kk * kk * cin).astype(jnp.bfloat16)

    acc = jnp.dot(patches, wf_ref[...],
                  preferred_element_type=jnp.float32)        # (M, 2*Cout)
    acc1 = acc[:, :cout]                                     # conv1
    accs = acc[:, cout:]                                     # skip conv

    y1_ref[...] = acc1.reshape(nb, ho, wo, cout).astype(y1_ref.dtype)
    ys_ref[...] = accs.reshape(nb, ho, wo, cout)
    st_ref[0] = jnp.concatenate(
        [jnp.sum(acc1, axis=0, keepdims=True),
         jnp.sum(acc1 * acc1, axis=0, keepdims=True),
         jnp.sum(accs, axis=0, keepdims=True),
         jnp.sum(accs * accs, axis=0, keepdims=True)], axis=0)


# ----------------------------------------------------------------------------
# Kernel B: BN1 (folded scale/shift) + ReLU fused into conv2 (k x k, stride 1)
#           as a single MXU dot, plus BN2 sum / sumsq epilogue.
# ----------------------------------------------------------------------------
def _bn_relu_conv_s1_kernel(y1_ref, a1_ref, w2_ref, y2_ref, st_ref, *, kk):
    # y1_ref  : (Nb, Ho, Wo, C)   bf16  conv1 output (pre-BN)
    # a1_ref  : (2, C)            f32   BN1 folded (scale, shift)
    # w2_ref  : (kk*kk*C, C)      bf16  conv2 taps (tap-major)
    # y2_ref  : (Nb, Ho, Wo, C)   f32   conv2 output (pre-BN)
    # st_ref  : (1, 2, C)         f32   [sum, sumsq] of y2
    nb, ho, wo, c = y2_ref.shape
    pad = kk // 2

    scale = a1_ref[0:1, :]
    shift = a1_ref[1:2, :]
    z = jnp.maximum(y1_ref[...].astype(jnp.float32) * scale + shift, 0.0)

    if pad:  # zero-pad via value concatenation (no scratch, halo zeros only)
        zw = jnp.zeros((nb, ho, pad, c), jnp.float32)
        z = jnp.concatenate([zw, z, zw], axis=2)
        zh = jnp.zeros((nb, pad, wo + 2 * pad, c), jnp.float32)
        z = jnp.concatenate([zh, z, zh], axis=1)

    taps = []
    for ki in range(kk):
        for kj in range(kk):
            taps.append(z[:, ki: ki + ho, kj: kj + wo, :])
    patches = jnp.concatenate(taps, axis=-1)                 # (Nb, Ho, Wo, kk*kk*C)
    patches = patches.reshape(nb * ho * wo, kk * kk * c).astype(jnp.bfloat16)

    acc = jnp.dot(patches, w2_ref[...],
                  preferred_element_type=jnp.float32)        # (M, C)

    y2_ref[...] = acc.reshape(nb, ho, wo, c)
    st_ref[0] = jnp.concatenate(
        [jnp.sum(acc, axis=0, keepdims=True),
         jnp.sum(acc * acc, axis=0, keepdims=True)], axis=0)


# ----------------------------------------------------------------------------
# Kernel C: out = ReLU( BN2(y2) + BN3(y_skip) ) on lane-dense flat views.
#           coef rows: [scale2_bcast, scale3_bcast, (shift2+shift3)_bcast]
# ----------------------------------------------------------------------------
def _bn_add_relu_kernel(y2_ref, ys_ref, coef_ref, o_ref):
    o_ref[...] = jnp.maximum(
        y2_ref[...] * coef_ref[0:1, :]
        + ys_ref[...] * coef_ref[1:2, :]
        + coef_ref[2:3, :], 0.0)


# ----------------------------------------------------------------------------
# Host-side helpers
# ----------------------------------------------------------------------------
def _fold_bn(sum_, sumsq, m, gamma, beta):
    """Fold batch statistics + affine params into per-channel (scale, shift)."""
    mean = sum_ / m
    var = sumsq / m - mean * mean            # biased variance (PyTorch training mode)
    scale = gamma * lax.rsqrt(var + EPS)
    shift = beta - mean * scale
    return jnp.stack([scale, shift], axis=0)                 # (2, C) f32


@functools.partial(jax.jit, static_argnames=("kernel_size",))
def first_sub_block_forward(x_nchw, params, kernel_size):
    """Pallas implementation of first_sub_block.forward. Input/output: NCHW."""
    k = kernel_size
    p = k // 2
    N, Cin, H, W = x_nchw.shape
    Cout = params["w1"].shape[0]

    Ho = (H + 2 * p - k) // 2 + 1
    Wo = (W + 2 * p - k) // 2 + 1
    Hq = Ho + (k - 1) // 2
    Wq = Wo + (k - 1) // 2
    M = N * Ho * Wo
    L = Ho * Wo * Cout

    Nb = _pick_batch_block(N, Ho * Wo)
    G = N // Nb

    # --- host prep: one pad + reshape/transpose pass builds the stride-2 phase
    #     split (N, 4*Hq, Wq, Cin) in bf16 (single pass over x). -----------------
    x = jnp.transpose(x_nchw, (0, 2, 3, 1))                           # NHWC
    xp = jnp.pad(x, ((0, 0),
                     (p, 2 * Hq - H - p),
                     (p, 2 * Wq - W - p),
                     (0, 0)))
    xph = (xp.reshape(N, Hq, 2, Wq, 2, Cin)
             .transpose(0, 2, 4, 1, 3, 5)                             # N, a, b, Hq, Wq, C
             .reshape(N, 4 * Hq, Wq, Cin)
             .astype(jnp.bfloat16))

    # Conv weights in tap-major im2col layout; skip conv folded into extra columns
    # (only the center-tap rows are non-zero).  Conv biases are dropped: training-
    # mode BN cancels them exactly.
    tc = (k // 2) * k + (k // 2)                                      # center tap
    w1t = jnp.transpose(params["w1"], (2, 3, 1, 0)).reshape(k * k * Cin, Cout)
    ws = jnp.transpose(params["w1x1"].reshape(Cout, Cin), (1, 0))     # (Cin, Cout)
    w_skip = jnp.zeros((k * k * Cin, Cout), w1t.dtype)
    w_skip = w_skip.at[tc * Cin:(tc + 1) * Cin, :].set(ws)
    wf = jnp.concatenate([w1t, w_skip], axis=1).astype(jnp.bfloat16)  # (k*k*Cin, 2*Cout)
    w2f = (jnp.transpose(params["w2"], (2, 3, 1, 0))
              .reshape(k * k * Cout, Cout).astype(jnp.bfloat16))

    cparams = pltpu.CompilerParams(dimension_semantics=("parallel",),
                                   vmem_limit_bytes=_VMEM_LIMIT)

    # --- kernel A: conv1 + skip conv in one dot, BN stats in epilogue ----------
    y1, ys, st_a = pl.pallas_call(
        functools.partial(_conv_s2_kernel, kk=k),
        out_shape=(jax.ShapeDtypeStruct((N, Ho, Wo, Cout), jnp.bfloat16),
                   jax.ShapeDtypeStruct((N, Ho, Wo, Cout), jnp.float32),
                   jax.ShapeDtypeStruct((G, 4, Cout), jnp.float32)),
        grid=(G,),
        in_specs=[pl.BlockSpec((Nb, 4 * Hq, Wq, Cin), lambda n: (n, 0, 0, 0)),
                  pl.BlockSpec((k * k * Cin, 2 * Cout), lambda n: (0, 0))],
        out_specs=(pl.BlockSpec((Nb, Ho, Wo, Cout), lambda n: (n, 0, 0, 0)),
                   pl.BlockSpec((Nb, Ho, Wo, Cout), lambda n: (n, 0, 0, 0)),
                   pl.BlockSpec((1, 4, Cout), lambda n: (n, 0, 0))),
        compiler_params=cparams,
    )(xph, wf)

    st_a = jnp.sum(st_a, axis=0)                                      # (4, C), tiny
    a1 = _fold_bn(st_a[0], st_a[1], M, params["g1"], params["be1"])
    a3 = _fold_bn(st_a[2], st_a[3], M, params["g3"], params["be3"])

    # --- kernel B: BN1+ReLU fused into conv2 (one dot), BN2 stats in epilogue --
    y2, st_b = pl.pallas_call(
        functools.partial(_bn_relu_conv_s1_kernel, kk=k),
        out_shape=(jax.ShapeDtypeStruct((N, Ho, Wo, Cout), jnp.float32),
                   jax.ShapeDtypeStruct((G, 2, Cout), jnp.float32)),
        grid=(G,),
        in_specs=[pl.BlockSpec((Nb, Ho, Wo, Cout), lambda n: (n, 0, 0, 0)),
                  pl.BlockSpec((2, Cout), lambda n: (0, 0)),
                  pl.BlockSpec((k * k * Cout, Cout), lambda n: (0, 0))],
        out_specs=(pl.BlockSpec((Nb, Ho, Wo, Cout), lambda n: (n, 0, 0, 0)),
                   pl.BlockSpec((1, 2, Cout), lambda n: (n, 0, 0))),
        compiler_params=cparams,
    )(y1, a1, w2f)

    st_b = jnp.sum(st_b, axis=0)
    a2 = _fold_bn(st_b[0], st_b[1], M, params["g2"], params["be2"])

    # --- kernel C: BN2 + BN3 + add + ReLU on lane-dense flat views --------------
    coef = jnp.stack([jnp.tile(a2[0], Ho * Wo),
                      jnp.tile(a3[0], Ho * Wo),
                      jnp.tile(a2[1] + a3[1], Ho * Wo)], axis=0)      # (3, L)
    y2f = y2.reshape(N, 1, L)                                         # free reshape
    ysf = ys.reshape(N, 1, L)

    out = pl.pallas_call(
        _bn_add_relu_kernel,
        out_shape=jax.ShapeDtypeStruct((N, 1, L), jnp.float32),
        grid=(G,),
        in_specs=[pl.BlockSpec((Nb, 1, L), lambda n: (n, 0, 0)),
                  pl.BlockSpec((Nb, 1, L), lambda n: (n, 0, 0)),
                  pl.BlockSpec((3, L), lambda n: (0, 0))],
        out_specs=pl.BlockSpec((Nb, 1, L), lambda n: (n, 0, 0)),
        input_output_aliases={0: 0},                                  # reuse y2's buffer
        compiler_params=cparams,
    )(y2f, ysf, coef)

    return jnp.transpose(out.reshape(N, Ho, Wo, Cout), (0, 3, 1, 2))  # NHWC -> NCHW


# ----------------------------------------------------------------------------
# Pure-JAX reference (mirrors PyTorch training-mode forward).  Conv operands are
# cast to bf16 (f32 accumulation) to match the kernel's MXU precision; the conv
# biases are kept here to demonstrate that they cancel exactly under batch BN.
# ----------------------------------------------------------------------------
def _ref_forward(x, params, kernel_size):
    k = kernel_size
    pad = k // 2

    def conv(x, w, b, s, p):
        y = lax.conv_general_dilated(
            x.astype(jnp.bfloat16), w.astype(jnp.bfloat16), (s, s),
            [(p, p), (p, p)], dimension_numbers=("NCHW", "OIHW", "NCHW"),
            preferred_element_type=jnp.float32)
        return y + b[None, :, None, None]

    def bn(y, g, b):
        m = jnp.mean(y, axis=(0, 2, 3), keepdims=True)
        v = jnp.mean((y - m) ** 2, axis=(0, 2, 3), keepdims=True)
        return (y - m) * lax.rsqrt(v + EPS) * g[None, :, None, None] + b[None, :, None, None]

    xs = bn(conv(x, params["w1x1"], params["b1x1"], 2, 0), params["g3"], params["be3"])
    x1 = jnp.maximum(bn(conv(x, params["w1"], params["b1"], 2, pad),
                        params["g1"], params["be1"]), 0.0)
    x2 = bn(conv(x1, params["w2"], params["b2"], 1, pad), params["g2"], params["be2"])
    return jnp.maximum(x2 + xs, 0.0)


# ----------------------------------------------------------------------------
def make_params(key, in_channels, kernel_size, num_filters):
    ks = jax.random.split(key, 6)
    k = kernel_size
    f = num_filters
    return {
        "w1":   0.1 * jax.random.normal(ks[0], (f, in_channels, k, k), jnp.float32),
        "b1":   0.1 * jax.random.normal(ks[1], (f,), jnp.float32),
        "w2":   0.1 * jax.random.normal(ks[2], (f, f, k, k), jnp.float32),
        "b2":   0.1 * jax.random.normal(ks[3], (f,), jnp.float32),
        "w1x1": 0.1 * jax.random.normal(ks[4], (f, in_channels, 1, 1), jnp.float32),
        "b1x1": 0.1 * jax.random.normal(ks[5], (f,), jnp.float32),
        # BatchNorm affine params: PyTorch default init (weight=1, bias=0)
        "g1": jnp.ones((f,), jnp.float32), "be1": jnp.zeros((f,), jnp.float32),
        "g2": jnp.ones((f,), jnp.float32), "be2": jnp.zeros((f,), jnp.float32),
        "g3": jnp.ones((f,), jnp.float32), "be3": jnp.zeros((f,), jnp.float32),
    }


if __name__ == "__main__":
    in_channels, kernel_size, num_filters = 4, 3, 8
    key = jax.random.PRNGKey(0)
    kx, kp = jax.random.split(key)

    x = jax.random.normal(kx, (2, in_channels, 16, 16), jnp.float32)   # NCHW
    params = make_params(kp, in_channels, kernel_size, num_filters)

    out = first_sub_block_forward(x, params, kernel_size=kernel_size)
    out = jax.block_until_ready(out)

    ref = _ref_forward(x, params, kernel_size)
    assert out.shape == ref.shape == (2, num_filters, 8, 8), out.shape
    err = float(jnp.max(jnp.abs(out - ref)))
    # y1 is kept in bf16 for the HBM round trip (both paths use bf16 MXU operands),
    # so allow a slightly wider tolerance than the pure-f32-intermediate version.
    assert err < 2e-2, f"max abs error {err}"

    print("KERNEL_OK")
</pallas_src>

<mosaic_0001>
module attributes {stable_mosaic.version = 11 : i64} {
  func.func @_conv_s2_kernel(%arg0: i32, %arg1: memref<1x36x9x4xbf16, #tpu.memory_space<vmem>>, %arg2: memref<36x16xbf16, #tpu.memory_space<vmem>>, %arg3: memref<1x8x8x8xbf16, #tpu.memory_space<vmem>>, %arg4: memref<1x8x8x8xf32, #tpu.memory_space<vmem>>, %arg5: memref<1x4x8xf32, #tpu.memory_space<vmem>>) attributes {dimension_semantics = [#tpu.dimension_semantics<parallel>], iteration_bounds = array<i64: 2>, scalar_prefetch = 0 : i64, scratch_operands = 0 : i64, tpu.core_type = #tpu.core_type<tc>, window_params = [{transform_indices = @transform_0, window_bounds = array<i64: 1, 36, 9, 4>}, {pipeline_mode = #tpu.pipeline_mode<synchronous>, transform_indices = @transform_1, window_bounds = array<i64: 36, 16>}, {transform_indices = @transform_2, window_bounds = array<i64: 1, 8, 8, 8>}, {transform_indices = @transform_3, window_bounds = array<i64: 1, 8, 8, 8>}, {transform_indices = @transform_4, window_bounds = array<i64: 1, 4, 8>}]} {
    %c0 = arith.constant 0 : index
    %c0_0 = arith.constant 0 : index
    %c0_1 = arith.constant 0 : index
    %c0_2 = arith.constant 0 : index
    %0 = vector.load %arg1[%c0, %c0_0, %c0_1, %c0_2] : memref<1x36x9x4xbf16, #tpu.memory_space<vmem>>, vector<1x36x9x4xbf16>
    %1 = arith.extf %0 : vector<1x36x9x4xbf16> to vector<1x36x9x4xf32>
    %2 = vector.extract_strided_slice %1 {offsets = [0, 0, 0, 0], sizes = [1, 8, 8, 4], strides = [1, 1, 1, 1]} : vector<1x36x9x4xf32> to vector<1x8x8x4xf32>
    %3 = vector.extract_strided_slice %1 {offsets = [0, 9, 0, 0], sizes = [1, 8, 8, 4], strides = [1, 1, 1, 1]} : vector<1x36x9x4xf32> to vector<1x8x8x4xf32>
    %4 = vector.extract_strided_slice %1 {offsets = [0, 0, 1, 0], sizes = [1, 8, 8, 4], strides = [1, 1, 1, 1]} : vector<1x36x9x4xf32> to vector<1x8x8x4xf32>
    %5 = vector.extract_strided_slice %1 {offsets = [0, 18, 0, 0], sizes = [1, 8, 8, 4], strides = [1, 1, 1, 1]} : vector<1x36x9x4xf32> to vector<1x8x8x4xf32>
    %6 = vector.extract_strided_slice %1 {offsets = [0, 27, 0, 0], sizes = [1, 8, 8, 4], strides = [1, 1, 1, 1]} : vector<1x36x9x4xf32> to vector<1x8x8x4xf32>
    %7 = vector.extract_strided_slice %1 {offsets = [0, 18, 1, 0], sizes = [1, 8, 8, 4], strides = [1, 1, 1, 1]} : vector<1x36x9x4xf32> to vector<1x8x8x4xf32>
    %8 = vector.extract_strided_slice %1 {offsets = [0, 1, 0, 0], sizes = [1, 8, 8, 4], strides = [1, 1, 1, 1]} : vector<1x36x9x4xf32> to vector<1x8x8x4xf32>
    %9 = vector.extract_strided_slice %1 {offsets = [0, 10, 0, 0], sizes = [1, 8, 8, 4], strides = [1, 1, 1, 1]} : vector<1x36x9x4xf32> to vector<1x8x8x4xf32>
    %10 = vector.extract_strided_slice %1 {offsets = [0, 1, 1, 0], sizes = [1, 8, 8, 4], strides = [1, 1, 1, 1]} : vector<1x36x9x4xf32> to vector<1x8x8x4xf32>
    %11 = tpu.concatenate %2, %3, %4, %5, %6, %7, %8, %9, %10 in 3 : vector<1x8x8x4xf32>, vector<1x8x8x4xf32>, vector<1x8x8x4xf32>, vector<1x8x8x4xf32>, vector<1x8x8x4xf32>, vector<1x8x8x4xf32>, vector<1x8x8x4xf32>, vector<1x8x8x4xf32>, vector<1x8x8x4xf32> -> vector<1x8x8x36xf32>
    %12 = vector.shape_cast %11 : vector<1x8x8x36xf32> to vector<64x36xf32>
    %13 = arith.truncf %12 : vector<64x36xf32> to vector<64x36xbf16>
    %c0_3 = arith.constant 0 : index
    %c0_4 = arith.constant 0 : index
    %14 = vector.load %arg2[%c0_3, %c0_4] : memref<36x16xbf16, #tpu.memory_space<vmem>>, vector<36x16xbf16>
    %cst = arith.constant dense<0.000000e+00> : vector<64x16xf32>
    %15 = tpu.matmul %13, %14, %cst {dimension_numbers = #tpu.dot_dimension_numbers<[1], [0], [0], [1], [0, 0, 1, 1], [], []>} : vector<64x36xbf16>, vector<36x16xbf16>, vector<64x16xf32> -> vector<64x16xf32>
    %16 = vector.extract_strided_slice %15 {offsets = [0, 0], sizes = [64, 8], strides = [1, 1]} : vector<64x16xf32> to vector<64x8xf32>
    %17 = vector.extract_strided_slice %15 {offsets = [0, 8], sizes = [64, 8], strides = [1, 1]} : vector<64x16xf32> to vector<64x8xf32>
    %18 = vector.shape_cast %16 : vector<64x8xf32> to vector<1x8x8x8xf32>
    %19 = arith.truncf %18 : vector<1x8x8x8xf32> to vector<1x8x8x8xbf16>
    %c0_5 = arith.constant 0 : index
    %c0_6 = arith.constant 0 : index
    %c0_7 = arith.constant 0 : index
    %c0_8 = arith.constant 0 : index
    %20 = vector.load %arg3[%c0_5, %c0_6, %c0_7, %c0_8] : memref<1x8x8x8xbf16, #tpu.memory_space<vmem>>, vector<1x8x8x8xbf16>
    tpu.vector_store %arg3[%c0_5, %c0_6, %c0_7, %c0_8], %19 {strides = array<i32>} : memref<1x8x8x8xbf16, #tpu.memory_space<vmem>>, vector<1x8x8x8xbf16>,
    %21 = vector.shape_cast %17 : vector<64x8xf32> to vector<1x8x8x8xf32>
    %c0_9 = arith.constant 0 : index
    %c0_10 = arith.constant 0 : index
    %c0_11 = arith.constant 0 : index
    %c0_12 = arith.constant 0 : index
    %22 = vector.load %arg4[%c0_9, %c0_10, %c0_11, %c0_12] : memref<1x8x8x8xf32, #tpu.memory_space<vmem>>, vector<1x8x8x8xf32>
    tpu.vector_store %arg4[%c0_9, %c0_10, %c0_11, %c0_12], %21 {strides = array<i32>} : memref<1x8x8x8xf32, #tpu.memory_space<vmem>>, vector<1x8x8x8xf32>,
    %cst_13 = arith.constant dense<0.000000e+00> : vector<8xf32>
    %23 = vector.multi_reduction <add>, %16, %cst_13 [0] : vector<64x8xf32> to vector<8xf32>
    %24 = vector.shape_cast %23 : vector<8xf32> to vector<1x8xf32>
    %25 = arith.mulf %16, %16 : vector<64x8xf32>
    %cst_14 = arith.constant dense<0.000000e+00> : vector<8xf32>
    %26 = vector.multi_reduction <add>, %25, %cst_14 [0] : vector<64x8xf32> to vector<8xf32>
    %27 = vector.shape_cast %26 : vector<8xf32> to vector<1x8xf32>
    %cst_15 = arith.constant dense<0.000000e+00> : vector<8xf32>
    %28 = vector.multi_reduction <add>, %17, %cst_15 [0] : vector<64x8xf32> to vector<8xf32>
    %29 = vector.shape_cast %28 : vector<8xf32> to vector<1x8xf32>
    %30 = arith.mulf %17, %17 : vector<64x8xf32>
    %cst_16 = arith.constant dense<0.000000e+00> : vector<8xf32>
    %31 = vector.multi_reduction <add>, %30, %cst_16 [0] : vector<64x8xf32> to vector<8xf32>
    %32 = vector.shape_cast %31 : vector<8xf32> to vector<1x8xf32>
    %33 = tpu.concatenate %24, %27, %29, %32 in 0 : vector<1x8xf32>, vector<1x8xf32>, vector<1x8xf32>, vector<1x8xf32> -> vector<4x8xf32>
    %c0_17 = arith.constant 0 : index
    %c0_18 = arith.constant 0 : index
    %c0_19 = arith.constant 0 : index
    %34 = vector.load %arg5[%c0_17, %c0_18, %c0_19] : memref<1x4x8xf32, #tpu.memory_space<vmem>>, vector<1x4x8xf32>
    %35 = vector.shape_cast %34 : vector<1x4x8xf32> to vector<4x8xf32>
    %36 = vector.shape_cast %33 : vector<4x8xf32> to vector<1x4x8xf32>
    tpu.vector_store %arg5[%c0_17, %c0_18, %c0_19], %36 {strides = array<i32>} : memref<1x4x8xf32, #tpu.memory_space<vmem>>, vector<1x4x8xf32>,
    return
  }
  func.func @transform_0(%arg0: i32) -> (i32, i32, i32, i32) {
    %c0_i32 = arith.constant 0 : i32
    %c0_i32_0 = arith.constant 0 : i32
    %c0_i32_1 = arith.constant 0 : i32
    %c0_i32_2 = arith.constant 0 : i32
    return %arg0, %c0_i32, %c0_i32_0, %c0_i32_1 : i32, i32, i32, i32
  }
  func.func @transform_1(%arg0: i32) -> (i32, i32) {
    %c0_i32 = arith.constant 0 : i32
    %c0_i32_0 = arith.constant 0 : i32
    %c0_i32_1 = arith.constant 0 : i32
    return %c0_i32, %c0_i32_0 : i32, i32
  }
  func.func @transform_2(%arg0: i32) -> (i32, i32, i32, i32) {
    %c0_i32 = arith.constant 0 : i32
    %c0_i32_0 = arith.constant 0 : i32
    %c0_i32_1 = arith.constant 0 : i32
    %c0_i32_2 = arith.constant 0 : i32
    return %arg0, %c0_i32, %c0_i32_0, %c0_i32_1 : i32, i32, i32, i32
  }
  func.func @transform_3(%arg0: i32) -> (i32, i32, i32, i32) {
    %c0_i32 = arith.constant 0 : i32
    %c0_i32_0 = arith.constant 0 : i32
    %c0_i32_1 = arith.constant 0 : i32
    %c0_i32_2 = arith.constant 0 : i32
    return %arg0, %c0_i32, %c0_i32_0, %c0_i32_1 : i32, i32, i32, i32
  }
  func.func @transform_4(%arg0: i32) -> (i32, i32, i32) {
    %c0_i32 = arith.constant 0 : i32
    %c0_i32_0 = arith.constant 0 : i32
    %c0_i32_1 = arith.constant 0 : i32
    return %arg0, %c0_i32, %c0_i32_0 : i32, i32, i32
  }
}

module attributes {stable_mosaic.version = 11 : i64} {
  func.func @_bn_relu_conv_s1_kernel(%arg0: i32, %arg1: memref<1x8x8x8xbf16, #tpu.memory_space<vmem>>, %arg2: memref<2x8xf32, #tpu.memory_space<vmem>>, %arg3: memref<72x8xbf16, #tpu.memory_space<vmem>>, %arg4: memref<1x8x8x8xf32, #tpu.memory_space<vmem>>, %arg5: memref<1x2x8xf32, #tpu.memory_space<vmem>>) attributes {dimension_semantics = [#tpu.dimension_semantics<parallel>], iteration_bounds = array<i64: 2>, scalar_prefetch = 0 : i64, scratch_operands = 0 : i64, tpu.core_type = #tpu.core_type<tc>, window_params = [{transform_indices = @transform_0, window_bounds = array<i64: 1, 8, 8, 8>}, {pipeline_mode = #tpu.pipeline_mode<synchronous>, transform_indices = @transform_1, window_bounds = array<i64: 2, 8>}, {pipeline_mode = #tpu.pipeline_mode<synchronous>, transform_indices = @transform_2, window_bounds = array<i64: 72, 8>}, {transform_indices = @transform_3, window_bounds = array<i64: 1, 8, 8, 8>}, {transform_indices = @transform_4, window_bounds = array<i64: 1, 2, 8>}]} {
    %c0 = arith.constant 0 : index
    %c0_0 = arith.constant 0 : index
    %0 = vector.load %arg2[%c0, %c0_0] : memref<2x8xf32, #tpu.memory_space<vmem>>, vector<1x8xf32>
    %c1 = arith.constant 1 : index
    %c0_1 = arith.constant 0 : index
    %1 = vector.load %arg2[%c1, %c0_1] : memref<2x8xf32, #tpu.memory_space<vmem>>, vector<1x8xf32>
    %c0_2 = arith.constant 0 : index
    %c0_3 = arith.constant 0 : index
    %c0_4 = arith.constant 0 : index
    %c0_5 = arith.constant 0 : index
    %2 = vector.load %arg1[%c0_2, %c0_3, %c0_4, %c0_5] : memref<1x8x8x8xbf16, #tpu.memory_space<vmem>>, vector<1x8x8x8xbf16>
    %3 = arith.extf %2 : vector<1x8x8x8xbf16> to vector<1x8x8x8xf32>
    %4 = vector.shape_cast %0 : vector<1x8xf32> to vector<1x1x1x8xf32>
    %5 = vector.broadcast %4 : vector<1x1x1x8xf32> to vector<1x8x8x8xf32>
    %6 = arith.mulf %3, %5 : vector<1x8x8x8xf32>
    %7 = vector.shape_cast %1 : vector<1x8xf32> to vector<1x1x1x8xf32>
    %8 = vector.broadcast %7 : vector<1x1x1x8xf32> to vector<1x8x8x8xf32>
    %9 = arith.addf %6, %8 : vector<1x8x8x8xf32>
    %cst = arith.constant 0.000000e+00 : f32
    %10 = vector.broadcast %cst : f32 to vector<1x8x8x8xf32>
    %11 = arith.maximumf %9, %10 : vector<1x8x8x8xf32>
    %cst_6 = arith.constant 0.000000e+00 : f32
    %12 = vector.broadcast %cst_6 : f32 to vector<1x8x1x8xf32>
    %13 = tpu.concatenate %12, %11, %12 in 2 : vector<1x8x1x8xf32>, vector<1x8x8x8xf32>, vector<1x8x1x8xf32> -> vector<1x8x10x8xf32>
    %cst_7 = arith.constant 0.000000e+00 : f32
    %14 = vector.broadcast %cst_7 : f32 to vector<1x1x10x8xf32>
    %15 = tpu.concatenate %14, %13, %14 in 1 : vector<1x1x10x8xf32>, vector<1x8x10x8xf32>, vector<1x1x10x8xf32> -> vector<1x10x10x8xf32>
    %16 = vector.extract_strided_slice %15 {offsets = [0, 0, 0, 0], sizes = [1, 8, 8, 8], strides = [1, 1, 1, 1]} : vector<1x10x10x8xf32> to vector<1x8x8x8xf32>
    %17 = vector.extract_strided_slice %15 {offsets = [0, 0, 1, 0], sizes = [1, 8, 8, 8], strides = [1, 1, 1, 1]} : vector<1x10x10x8xf32> to vector<1x8x8x8xf32>
    %18 = vector.extract_strided_slice %15 {offsets = [0, 0, 2, 0], sizes = [1, 8, 8, 8], strides = [1, 1, 1, 1]} : vector<1x10x10x8xf32> to vector<1x8x8x8xf32>
    %19 = vector.extract_strided_slice %15 {offsets = [0, 1, 0, 0], sizes = [1, 8, 8, 8], strides = [1, 1, 1, 1]} : vector<1x10x10x8xf32> to vector<1x8x8x8xf32>
    %20 = vector.extract_strided_slice %15 {offsets = [0, 1, 1, 0], sizes = [1, 8, 8, 8], strides = [1, 1, 1, 1]} : vector<1x10x10x8xf32> to vector<1x8x8x8xf32>
    %21 = vector.extract_strided_slice %15 {offsets = [0, 1, 2, 0], sizes = [1, 8, 8, 8], strides = [1, 1, 1, 1]} : vector<1x10x10x8xf32> to vector<1x8x8x8xf32>
    %22 = vector.extract_strided_slice %15 {offsets = [0, 2, 0, 0], sizes = [1, 8, 8, 8], strides = [1, 1, 1, 1]} : vector<1x10x10x8xf32> to vector<1x8x8x8xf32>
    %23 = vector.extract_strided_slice %15 {offsets = [0, 2, 1, 0], sizes = [1, 8, 8, 8], strides = [1, 1, 1, 1]} : vector<1x10x10x8xf32> to vector<1x8x8x8xf32>
    %24 = vector.extract_strided_slice %15 {offsets = [0, 2, 2, 0], sizes = [1, 8, 8, 8], strides = [1, 1, 1, 1]} : vector<1x10x10x8xf32> to vector<1x8x8x8xf32>
    %25 = tpu.concatenate %16, %17, %18, %19, %20, %21, %22, %23, %24 in 3 : vector<1x8x8x8xf32>, vector<1x8x8x8xf32>, vector<1x8x8x8xf32>, vector<1x8x8x8xf32>, vector<1x8x8x8xf32>, vector<1x8x8x8xf32>, vector<1x8x8x8xf32>, vector<1x8x8x8xf32>, vector<1x8x8x8xf32> -> vector<1x8x8x72xf32>
    %26 = vector.shape_cast %25 : vector<1x8x8x72xf32> to vector<64x72xf32>
    %27 = arith.truncf %26 : vector<64x72xf32> to vector<64x72xbf16>
    %c0_8 = arith.constant 0 : index
    %c0_9 = arith.constant 0 : index
    %28 = vector.load %arg3[%c0_8, %c0_9] : memref<72x8xbf16, #tpu.memory_space<vmem>>, vector<72x8xbf16>
    %cst_10 = arith.constant dense<0.000000e+00> : vector<64x8xf32>
    %29 = tpu.matmul %27, %28, %cst_10 {dimension_numbers = #tpu.dot_dimension_numbers<[1], [0], [0], [1], [0, 0, 1, 1], [], []>} : vector<64x72xbf16>, vector<72x8xbf16>, vector<64x8xf32> -> vector<64x8xf32>
    %30 = vector.shape_cast %29 : vector<64x8xf32> to vector<1x8x8x8xf32>
    %c0_11 = arith.constant 0 : index
    %c0_12 = arith.constant 0 : index
    %c0_13 = arith.constant 0 : index
    %c0_14 = arith.constant 0 : index
    %31 = vector.load %arg4[%c0_11, %c0_12, %c0_13, %c0_14] : memref<1x8x8x8xf32, #tpu.memory_space<vmem>>, vector<1x8x8x8xf32>
    tpu.vector_store %arg4[%c0_11, %c0_12, %c0_13, %c0_14], %30 {strides = array<i32>} : memref<1x8x8x8xf32, #tpu.memory_space<vmem>>, vector<1x8x8x8xf32>,
    %cst_15 = arith.constant dense<0.000000e+00> : vector<8xf32>
    %32 = vector.multi_reduction <add>, %29, %cst_15 [0] : vector<64x8xf32> to vector<8xf32>
    %33 = vector.shape_cast %32 : vector<8xf32> to vector<1x8xf32>
    %34 = arith.mulf %29, %29 : vector<64x8xf32>
    %cst_16 = arith.constant dense<0.000000e+00> : vector<8xf32>
    %35 = vector.multi_reduction <add>, %34, %cst_16 [0] : vector<64x8xf32> to vector<8xf32>
    %36 = vector.shape_cast %35 : vector<8xf32> to vector<1x8xf32>
    %37 = tpu.concatenate %33, %36 in 0 : vector<1x8xf32>, vector<1x8xf32> -> vector<2x8xf32>
    %c0_17 = arith.constant 0 : index
    %c0_18 = arith.constant 0 : index
    %c0_19 = arith.constant 0 : index
    %38 = vector.load %arg5[%c0_17, %c0_18, %c0_19] : memref<1x2x8xf32, #tpu.memory_space<vmem>>, vector<1x2x8xf32>
    %39 = vector.shape_cast %38 : vector<1x2x8xf32> to vector<2x8xf32>
    %40 = vector.shape_cast %37 : vector<2x8xf32> to vector<1x2x8xf32>
    tpu.vector_store %arg5[%c0_17, %c0_18, %c0_19], %40 {strides = array<i32>} : memref<1x2x8xf32, #tpu.memory_space<vmem>>, vector<1x2x8xf32>,
    return
  }
  func.func @transform_0(%arg0: i32) -> (i32, i32, i32, i32) {
    %c0_i32 = arith.constant 0 : i32
    %c0_i32_0 = arith.constant 0 : i32
    %c0_i32_1 = arith.constant 0 : i32
    %c0_i32_2 = arith.constant 0 : i32
    return %arg0, %c0_i32, %c0_i32_0, %c0_i32_1 : i32, i32, i32, i32
  }
  func.func @transform_1(%arg0: i32) -> (i32, i32) {
    %c0_i32 = arith.constant 0 : i32
    %c0_i32_0 = arith.constant 0 : i32
    %c0_i32_1 = arith.constant 0 : i32
    return %c0_i32, %c0_i32_0 : i32, i32
  }
  func.func @transform_2(%arg0: i32) -> (i32, i32) {
    %c0_i32 = arith.constant 0 : i32
    %c0_i32_0 = arith.constant 0 : i32
    %c0_i32_1 = arith.constant 0 : i32
    return %c0_i32, %c0_i32_0 : i32, i32
  }
  func.func @transform_3(%arg0: i32) -> (i32, i32, i32, i32) {
    %c0_i32 = arith.constant 0 : i32
    %c0_i32_0 = arith.constant 0 : i32
    %c0_i32_1 = arith.constant 0 : i32
    %c0_i32_2 = arith.constant 0 : i32
    return %arg0, %c0_i32, %c0_i32_0, %c0_i32_1 : i32, i32, i32, i32
  }
  func.func @transform_4(%arg0: i32) -> (i32, i32, i32) {
    %c0_i32 = arith.constant 0 : i32
    %c0_i32_0 = arith.constant 0 : i32
    %c0_i32_1 = arith.constant 0 : i32
    return %arg0, %c0_i32, %c0_i32_0 : i32, i32, i32
  }
}

module attributes {stable_mosaic.version = 11 : i64} {
  func.func @_bn_add_relu_kernel(%arg0: i32, %arg1: memref<1x1x512xf32, #tpu.memory_space<vmem>>, %arg2: memref<1x1x512xf32, #tpu.memory_space<vmem>>, %arg3: memref<3x512xf32, #tpu.memory_space<vmem>>, %arg4: memref<1x1x512xf32, #tpu.memory_space<vmem>>) attributes {dimension_semantics = [#tpu.dimension_semantics<parallel>], iteration_bounds = array<i64: 2>, scalar_prefetch = 0 : i64, scratch_operands = 0 : i64, tpu.core_type = #tpu.core_type<tc>, window_params = [{transform_indices = @transform_0, window_bounds = array<i64: 1, 1, 512>}, {transform_indices = @transform_1, window_bounds = array<i64: 1, 1, 512>}, {pipeline_mode = #tpu.pipeline_mode<synchronous>, transform_indices = @transform_2, window_bounds = array<i64: 3, 512>}, {transform_indices = @transform_3, window_bounds = array<i64: 1, 1, 512>}]} {
    %c0 = arith.constant 0 : index
    %c0_0 = arith.constant 0 : index
    %c0_1 = arith.constant 0 : index
    %0 = vector.load %arg1[%c0, %c0_0, %c0_1] : memref<1x1x512xf32, #tpu.memory_space<vmem>>, vector<1x1x512xf32>
    %c0_2 = arith.constant 0 : index
    %c0_3 = arith.constant 0 : index
    %1 = vector.load %arg3[%c0_2, %c0_3] : memref<3x512xf32, #tpu.memory_space<vmem>>, vector<1x512xf32>
    %2 = vector.shape_cast %1 : vector<1x512xf32> to vector<1x1x512xf32>
    %3 = arith.mulf %0, %2 : vector<1x1x512xf32>
    %c0_4 = arith.constant 0 : index
    %c0_5 = arith.constant 0 : index
    %c0_6 = arith.constant 0 : index
    %4 = vector.load %arg2[%c0_4, %c0_5, %c0_6] : memref<1x1x512xf32, #tpu.memory_space<vmem>>, vector<1x1x512xf32>
    %c1 = arith.constant 1 : index
    %c0_7 = arith.constant 0 : index
    %5 = vector.load %arg3[%c1, %c0_7] : memref<3x512xf32, #tpu.memory_space<vmem>>, vector<1x512xf32>
    %6 = vector.shape_cast %5 : vector<1x512xf32> to vector<1x1x512xf32>
    %7 = arith.mulf %4, %6 : vector<1x1x512xf32>
    %8 = arith.addf %3, %7 : vector<1x1x512xf32>
    %c2 = arith.constant 2 : index
    %c0_8 = arith.constant 0 : index
    %9 = vector.load %arg3[%c2, %c0_8] : memref<3x512xf32, #tpu.memory_space<vmem>>, vector<1x512xf32>
    %10 = vector.shape_cast %9 : vector<1x512xf32> to vector<1x1x512xf32>
    %11 = arith.addf %8, %10 : vector<1x1x512xf32>
    %cst = arith.constant 0.000000e+00 : f32
    %12 = vector.broadcast %cst : f32 to vector<1x1x512xf32>
    %13 = arith.maximumf %11, %12 : vector<1x1x512xf32>
    %c0_9 = arith.constant 0 : index
    %c0_10 = arith.constant 0 : index
    %c0_11 = arith.constant 0 : index
    %14 = vector.load %arg4[%c0_9, %c0_10, %c0_11] : memref<1x1x512xf32, #tpu.memory_space<vmem>>, vector<1x1x512xf32>
    tpu.vector_store %arg4[%c0_9, %c0_10, %c0_11], %13 {strides = array<i32>} : memref<1x1x512xf32, #tpu.memory_space<vmem>>, vector<1x1x512xf32>,
    return
  }
  func.func @transform_0(%arg0: i32) -> (i32, i32, i32) {
    %c0_i32 = arith.constant 0 : i32
    %c0_i32_0 = arith.constant 0 : i32
    %c0_i32_1 = arith.constant 0 : i32
    return %arg0, %c0_i32, %c0_i32_0 : i32, i32, i32
  }
  func.func @transform_1(%arg0: i32) -> (i32, i32, i32) {
    %c0_i32 = arith.constant 0 : i32
    %c0_i32_0 = arith.constant 0 : i32
    %c0_i32_1 = arith.constant 0 : i32
    return %arg0, %c0_i32, %c0_i32_0 : i32, i32, i32
  }
  func.func @transform_2(%arg0: i32) -> (i32, i32) {
    %c0_i32 = arith.constant 0 : i32
    %c0_i32_0 = arith.constant 0 : i32
    %c0_i32_1 = arith.constant 0 : i32
    return %c0_i32, %c0_i32_0 : i32, i32
  }
  func.func @transform_3(%arg0: i32) -> (i32, i32, i32) {
    %c0_i32 = arith.constant 0 : i32
    %c0_i32_0 = arith.constant 0 : i32
    %c0_i32_1 = arith.constant 0 : i32
    return %arg0, %c0_i32, %c0_i32_0 : i32, i32, i32
  }
}

</mosaic_0001>

<bundles_post_ra>
// kernel: tile.15
= control target key start
LH: loop header
LB: loop body
LE: loop exit
PB: predicated region body
PF: predicated region fallthrough
CT: control target
= control target key end

     0   :  { %s64_s0 = inlined_call_operand.vmem [shape: f32[8], index: 0, kind: input, shape index: {}]   ;;  %s65_s1 = inlined_call_operand.vmem [shape: f32[64,8], index: 1, kind: output, shape index: {}]  }
   0x1   :  { %v4_v0 = vld [vmem:[%s64_s0] ss:$0 sm:$0xff] }
   0x2   :  { %5 = vst [vmem:[%s65_s1] sm:$0xff] %v4_v0  ;;  %20 = vst [vmem:[%s65_s1 + $0x8] sm:$0xff] %v4_v0 }
   0x3   :  { %21 = vst [vmem:[%s65_s1 + $0x10] sm:$0xff] %v4_v0  ;;  %22 = vst [vmem:[%s65_s1 + $0x18] sm:$0xff] %v4_v0 }
   0x4   :  { %23 = vst [vmem:[%s65_s1 + $0x20] sm:$0xff] %v4_v0  ;;  %24 = vst [vmem:[%s65_s1 + $0x28] sm:$0xff] %v4_v0 }
   0x5   :  { %25 = vst [vmem:[%s65_s1 + $0x30] sm:$0xff] %v4_v0  ;;  %26 = vst [vmem:[%s65_s1 + $0x38] sm:$0xff] %v4_v0 }

// kernel: tile.23
= control target key start
LH: loop header
LB: loop body
LE: loop exit
PB: predicated region body
PF: predicated region fallthrough
CT: control target
= control target key end

     0   :  { %vm6_vm0 = vcmask 1043458   ;;  %s11_s6 = smov 3  ;;  %s14_s7 = smov 12  ;;  %vm8_vm1 = vcmask 64512   ;;  %vm20_vm2 = vcmask 1048512   ;;  %vm32_vm3 = vcmask 982912   ;;  %s412_s0 = inlined_call_operand.vmem [shape: f32[64,8], index: 0, kind: input, shape index: {}]   ;;  %s413_s1 = inlined_call_operand.vmem [shape: f32[1,512], index: 1, kind: output, shape index: {}]  }
   0x1   :  { %v215_v0 = vld [vmem:[%s412_s0 + $0xf] ss:$16 sm:%s11_s6]   ;;  %s35_s12 = smov 3  ;;  %s38_s15 = smov 12  ;;  %vm44_vm4 = vcmask 917312   ;;  %vm56_vm5 = vcmask 851712  }
   0x2   :  { %v216_v1 = vld [vmem:[%s412_s0 + $0xf] ss:$16 sm:%s14_s7]   ;;  %v219_v3 = vld [vmem:[%s412_s0 + $0xd] ss:$16 sm:%s35_s12]   ;;  %s263_s16 = smov 120   ;;  %s23_s19 = smov 3 }
   0x3   :  { %v17_v2 = vsel %vm6_vm0, %v216_v1, %v215_v0  ;;  %v220_v4 = vld [vmem:[%s412_s0 + $0xd] ss:$16 sm:%s38_s15]   ;;  %s26_s20 = smov 12  ;;  %v217_v6 = vld [vmem:[%s412_s0 + $0xe] ss:$16 sm:%s23_s19]   ;;  %s47_s25 = smov 3 }
   0x4   :  { %18 = vrot.lane.b32.xlu0 %v17_v2, %s263_s16  ;;  %v41_v5 = vsel %vm6_vm0, %v220_v4, %v219_v3  ;;  %v218_v7 = vld [vmem:[%s412_s0 + $0xe] ss:$16 sm:%s26_s20]   ;;  %s264_s26 = smov 104   ;;  %s50_s29 = smov 12  ;;  %vm68_vm6 = vcmask 786112   ;;  %vm80_vm7 = vcmask 720512  }
   0x5   :  { %42 = vrot.lane.b32.xlu1 %v41_v5, %s264_s26  ;;  %v29_v8 = vsel %vm6_vm0, %v218_v7, %v217_v6  ;;  %v221_v9 = vld [vmem:[%s412_s0 + $0xc] ss:$16 sm:%s47_s25]   ;;  %s59_s3 = smov 3  ;;  %s62_s4 = smov 12  ;;  %vm92_vm8 = vcmask 654912   ;;  %vm104_vm9 = vcmask 589312  }
   0x6   :  { %v222_v10 = vld [vmem:[%s412_s0 + $0xc] ss:$16 sm:%s50_s29]   ;;  %s265_s5 = smov 112   ;;  %v223_v12 = vld [vmem:[%s412_s0 + $0xb] ss:$16 sm:%s59_s3]   ;;  %s71_s8 = smov 3 }
   0x7   :  { %v53_v11 = vsel %vm6_vm0, %v222_v10, %v221_v9  ;;  %v224_v13 = vld [vmem:[%s412_s0 + $0xb] ss:$16 sm:%s62_s4]   ;;  %v225_v14 = vld [vmem:[%s412_s0 + $0xa] ss:$16 sm:%s71_s8]   ;;  %s74_s13 = smov 12  ;;  %s266_s14 = smov 96  }
   0x8   :  { %30 = vrot.lane.b32.xlu0 %v29_v8, %s265_s5  ;;  %v65_v15 = vsel %vm6_vm0, %v224_v13, %v223_v12  ;;  %v226_v16 = vld [vmem:[%s412_s0 + $0xa] ss:$16 sm:%s74_s13]   ;;  %s83_s17 = smov 3  ;;  %s86_s18 = smov 12  ;;  %vm116_vm10 = vcmask 523712   ;;  %vm128_vm11 = vcmask 458112  }
   0x9   :  { %54 = vrot.lane.b32.xlu1 %v53_v11, %s266_s14  ;;  %v77_v17 = vsel %vm6_vm0, %v226_v16, %v225_v14  ;;  %v227_v18 = vld [vmem:[%s412_s0 + $0x9] ss:$16 sm:%s83_s17]   ;;  %s95_s23 = smov 3  ;;  %s267_s24 = smov 88   ;;  %vm140_vm12 = vcmask 392512   ;;  %vm152_vm13 = vcmask 326912  }
   0xa   :  { %v228_v19 = vld [vmem:[%s412_s0 + $0x9] ss:$16 sm:%s86_s18]   ;;  %v229_v20 = vld [vmem:[%s412_s0 + $0x8] ss:$16 sm:%s95_s23]   ;;  %s98_s27 = smov 12  ;;  %s107_s30 = smov 3 }
   0xb   :  { %v89_v21 = vsel %vm6_vm0, %v228_v19, %v227_v18  ;;  %v230_v22 = vld [vmem:[%s412_s0 + $0x8] ss:$16 sm:%s98_s27]   ;;  %s110_s2 = smov 12  ;;  %s268_s3 = smov 80   ;;  %v231_v23 = vld [vmem:[%s412_s0 + $0x7] ss:$16 sm:%s107_s30]  }
   0xc   :  { %66 = vrot.lane.b32.xlu0 %v65_v15, %s267_s24  ;;  %s119_s6 = smov 3  ;;  %v101_v24 = vsel %vm6_vm0, %v230_v22, %v229_v20  ;;  %v232_v25 = vld [vmem:[%s412_s0 + $0x7] ss:$16 sm:%s110_s2]   ;;  %s122_s11 = smov 12  ;;  %vm164_vm14 = vcmask 261312   ;;  %vm176_vm15 = vcmask 195712  }
   0xd   :  { %78 = vrot.lane.b32.xlu1 %v77_v17, %s268_s3  ;;  %v233_v26 = vld [vmem:[%s412_s0 + $0x6] ss:$16 sm:%s119_s6]   ;;  %s269_s12 = smov 72   ;;  %s131_s15 = smov 3  ;;  %v113_v28 = vsel %vm6_vm0, %v232_v25, %v231_v23 }
   0xe   :  { %v234_v27 = vld [vmem:[%s412_s0 + $0x6] ss:$16 sm:%s122_s11]   ;;  %s134_s16 = smov 12  ;;  %v235_v29 = vld [vmem:[%s412_s0 + $0x5] ss:$16 sm:%s131_s15]   ;;  %s143_s19 = smov 3 }
   0xf   :  { %s270_s20 = smov 64   ;;  %v236_v30 = vld [vmem:[%s412_s0 + $0x5] ss:$16 sm:%s134_s16]   ;;  %s146_s23 = smov 12  ;;  %v125_v31 = vsel %vm6_vm0, %v234_v27, %v233_v26  ;;  %v237_v32 = vld [vmem:[%s412_s0 + $0x4] ss:$16 sm:%s143_s19]  }
  0x10   :  { %90 = vrot.lane.b32.xlu0 %v89_v21, %s269_s12  ;;  %s155_s26 = smov 3  ;;  %s158_s27 = smov 12  ;;  %v238_v33 = vld [vmem:[%s412_s0 + $0x4] ss:$16 sm:%s146_s23]   ;;  %v137_v34 = vsel %vm6_vm0, %v236_v30, %v235_v29 }
  0x11   :  { %102 = vrot.lane.b32.xlu1 %v101_v24, %s270_s20  ;;  %s271_s28 = smov 56   ;;  %s167_s2 = smov 3  ;;  %v239_v35 = vld [vmem:[%s412_s0 + $0x3] ss:$16 sm:%s155_s26]   ;;  %v149_v37 = vsel %vm6_vm0, %v238_v33, %v237_v32 }
  0x12   :  { %s170_s5 = smov 12  ;;  %s272_s6 = smov 48   ;;  %v240_v36 = vld [vmem:[%s412_s0 + $0x3] ss:$16 sm:%s158_s27]   ;;  %v241_v38 = vld [vmem:[%s412_s0 + $0x2] ss:$16 sm:%s167_s2]  }
  0x13   :  { %s179_s9 = smov 3  ;;  %v242_v39 = vld [vmem:[%s412_s0 + $0x2] ss:$16 sm:%s170_s5]   ;;  %s182_s14 = smov 12  ;;  %v161_v41 = vsel %vm6_vm0, %v240_v36, %v239_v35 }
  0x14   :  { %114 = vrot.lane.b32.xlu0 %v113_v28, %s271_s28  ;;  %s2_s15 = smov 3  ;;  %s273_s16 = smov 40   ;;  %v243_v42 = vld [vmem:[%s412_s0 + $0x1] ss:$16 sm:%s179_s9]   ;;  %v173_v46 = vsel %vm6_vm0, %v242_v39, %v241_v38 }
  0x15   :  { %126 = vrot.lane.b32.xlu1 %v125_v31, %s272_s6  ;;  %v3_v40 = vld [vmem:[%s412_s0] ss:$16 sm:%s2_s15]   ;;  %s4_s19 = smov 12  ;;  %s274_s24 = smov 32  }
  0x16   :  { %v5_v43 = vld [vmem:[%s412_s0] ss:$16 sm:%s4_s19]   ;;  %v244_v44 = vld [vmem:[%s412_s0 + $0x1] ss:$16 sm:%s182_s14]   ;;  %s275_s0 = smov 24   ;;  %s276_s27 = smov 16  }
  0x17   :  { %v7_v45 = vsel %vm6_vm0, %v5_v43, %v3_v40  ;;  %v185_v47 = vsel %vm6_vm0, %v244_v44, %v243_v42  ;;  %s277_s28 = smov 8   ;;  %vm188_vm0 = vcmask 130112  }
  0x18   :  { %138 = vrot.lane.b32.xlu0 %v137_v34, %s273_s16  ;;  %9 = vst.msk [vmem:[#allocation0] ss:$8 sm:$0xf] %vm8_vm1, %v7_v45  }
  0x19   :  { %150 = vrot.lane.b32.xlu1 %v149_v37, %s274_s24 }
  0x1c   :  { %162 = vrot.lane.b32.xlu0 %v161_v41, %s275_s0 }
  0x1d   :  { %174 = vrot.lane.b32.xlu1 %v173_v46, %s276_s27 }
  0x20   :  { %186 = vrot.lane.b32.xlu0 %v185_v47, %s277_s28 }
  0x76   :  { %v19_v48 = vpop.permute.xlu0 %18  }
  0x77   :  { %21 = vst.msk [vmem:[#allocation0] ss:$8 sm:$0xf] %vm20_vm2, %v19_v48   ;;  %v43_v49 = vpop.permute.xlu1 %42  }
  0x7a   :  { %v31_v50 = vpop.permute.xlu0 %30  }
  0x7b   :  { %33 = vst.msk [vmem:[#allocation0] ss:$8 sm:$0xf] %vm32_vm3, %v31_v50   ;;  %v55_v51 = vpop.permute.xlu1 %54  }
  0x7c   :  { %45 = vst.msk [vmem:[#allocation0] ss:$8 sm:$0xf] %vm44_vm4, %v43_v49  }
  0x7d   :  { %57 = vst.msk [vmem:[#allocation0] ss:$8 sm:$0xf] %vm56_vm5, %v55_v51  }
  0x7e   :  { %v67_v52 = vpop.permute.xlu0 %66  }
  0x7f   :  { %69 = vst.msk [vmem:[#allocation0] ss:$8 sm:$0xf] %vm68_vm6, %v67_v52   ;;  %v79_v53 = vpop.permute.xlu1 %78  }
  0x80   :  { %81 = vst.msk [vmem:[#allocation0] ss:$8 sm:$0xf] %vm80_vm7, %v79_v53  }
  0x82   :  { %v91_v54 = vpop.permute.xlu0 %90  }
  0x83   :  { %93 = vst.msk [vmem:[#allocation0] ss:$8 sm:$0xf] %vm92_vm8, %v91_v54   ;;  %v103_v55 = vpop.permute.xlu1 %102  }
  0x84   :  { %105 = vst.msk [vmem:[#allocation0] ss:$8 sm:$0xf] %vm104_vm9, %v103_v55  }
  0x86   :  { %v115_v56 = vpop.permute.xlu0 %114  }
  0x87   :  { %117 = vst.msk [vmem:[#allocation0] ss:$8 sm:$0xf] %vm116_vm10, %v115_v56   ;;  %v127_v57 = vpop.permute.xlu1 %126  }
  0x88   :  { %129 = vst.msk [vmem:[#allocation0] ss:$8 sm:$0xf] %vm128_vm11, %v127_v57  }
  0x8a   :  { %v139_v58 = vpop.permute.xlu0 %138  }
  0x8b   :  { %141 = vst.msk [vmem:[#allocation0] ss:$8 sm:$0xf] %vm140_vm12, %v139_v58   ;;  %v151_v59 = vpop.permute.xlu1 %150  }
  0x8c   :  { %153 = vst.msk [vmem:[#allocation0] ss:$8 sm:$0xf] %vm152_vm13, %v151_v59  }
  0x8e   :  { %v163_v60 = vpop.permute.xlu0 %162  }
  0x8f   :  { %165 = vst.msk [vmem:[#allocation0] ss:$8 sm:$0xf] %vm164_vm14, %v163_v60   ;;  %v175_v61 = vpop.permute.xlu1 %174  }
  0x90   :  { %177 = vst.msk [vmem:[#allocation0] ss:$8 sm:$0xf] %vm176_vm15, %v175_v61  }
  0x92   :  { %v187_v62 = vpop.permute.xlu0 %186  }
  0x93   :  { %189 = vst.msk [vmem:[#allocation0] ss:$8 sm:$0xf] %vm188_vm0, %v187_v62  }
  0x9a   :  { %v193_v63 = vld [vmem:[#allocation0] sm:$0x1]  ;;  %v197_v0 = vld [vmem:[#allocation0 + $0x8] sm:$0x1]  ;;  %v202_v1 = vld [vmem:[#allocation0 + $0x10] sm:$0x1] }
  0x9b   :  { %195 = vst [vmem:[%s413_s1] sm:$0x1] %v193_v63  ;;  %245 = vst [vmem:[%s413_s1 + $0x1] sm:$0x1] %v197_v0  ;;  %v208_v2 = vld [vmem:[#allocation0 + $0x18] sm:$0x1] }
  0x9c   :  { %246 = vst [vmem:[%s413_s1 + $0x2] sm:$0x1] %v202_v1  ;;  %247 = vst [vmem:[%s413_s1 + $0x3] sm:$0x1] %v208_v2 }

// kernel: first_sub_block_forward.4
= control target key start
LH: loop header
LB: loop body
LE: loop exit
PB: predicated region body
PF: predicated region fallthrough
CT: control target
= control target key end

     0   :  { %s1212_s15 = smov 0   ;;  %s1536_s0 = inlined_call_operand.vmem [shape: bf16[2,8,8,8], index: 0, kind: input, shape index: {}]   ;;  %s1537_s1 = inlined_call_operand.vmem [shape: f32[2,8], index: 1, kind: input, shape index: {}]   ;;  %s1538_s2 = inlined_call_operand.vmem [shape: bf16[72,8], index: 2, kind: input, shape index: {}]   ;;  %s1539_s3 = inlined_call_operand.vmem [shape: f32[2,8,8,8], index: 3, kind: output, shape index: {0}]   ;;  %s1540_s4 = inlined_call_operand.vmem [shape: f32[2,2,8], index: 4, kind: output, shape index: {1}]  }
   0x1 LB: > { %s905_s16 = sadd.s32 4294967295, %s1176_s15   ;;  %p909_p0 = scmp.ge.s32.totalorder %s1176_s15, 1  ;;  %s1176_s15 = sphi %s1212_s15, %s15_s15  }
   0x2   : > { %p165_p1 = scmp.lt.s32.totalorder %s1176_s15, 3 }
   0x4   : > { %p166_p2 = pnand %p909_p0, %p165_p1 }
   0x5   : > { %p195_p3 = scmp.lt.s32.totalorder (!%p166_p2), %s905_s16, 1  ;;  %v1229_v0 = vld [vmem:[%s1537_s1] ss:$0 sm:$0xff] (!%p166_p2)  ;;  %v1234_v8 = vld [vmem:[%s1537_s1 + $0x1] ss:$0 sm:$0xff] (!%p166_p2)  ;;  %vm284_vm0 = vcmask (!%p166_p2), 1040384  }
   0x6   : > { %169 = sbr.rel (%p166_p2) target bundleno = 449 (0x1c1), region = 32  ;;  %vm364_vm1 = vcmask (!%p166_p2), 1045504   ;;  %v1178_v27 = vmov (!%p166_p2), 0.0   ;;  %vm316_vm2 = vcmask (!%p166_p2), 1046528   ;;  %s1179_s25 = smov (!%p166_p2), 24   ;;  %vm689_vm3 = vcmask (!%p166_p2), 1043456  }
   0x7   : > { %v1249_v28 = vrot.slane (!%p166_p2), %v1178_v27, 2  ;;  %v1254_v34 = vrot.slane (!%p166_p2), %v1178_v27, 1  ;;  %s1180_s28 = smov (!%p166_p2), 48   ;;  %s1181_s5 = smov (!%p166_p2), 16   ;;  %vm564_vm4 = vcmask (!%p166_p2), 64512   ;;  %vm573_vm5 = vcmask (!%p166_p2), 130048  }
   0x8   : > { %s1182_s6 = smov (!%p166_p2), 8   ;;  %s1183_s11 = smov (!%p166_p2), 32   ;;  %vm582_vm6 = vcmask (!%p166_p2), 195584   ;;  %vm591_vm7 = vcmask (!%p166_p2), 261120   ;;  %vm600_vm8 = vcmask (!%p166_p2), 326656   ;;  %vm609_vm9 = vcmask (!%p166_p2), 392192  }
   0x9   : > { %s1184_s12 = smov (!%p166_p2), 40   ;;  %s1186_s18 = smov (!%p166_p2), 64   ;;  %vm618_vm10 = vcmask (!%p166_p2), 457728   ;;  %vm627_vm11 = vcmask (!%p166_p2), 523264   ;;  %vm676_vm12 = vcmask (!%p166_p2), 588800   ;;  %vm817_vm13 = vcmask (!%p166_p2), 58368  }
   0xd   : > { %s1542_s16 = smov (!%p195_p3, %s905_s16), 1 }
   0xe   : > { %s928_s17 = sshll.u32 %s1542_s16, 5  ;;  %s929_s19 = sshll.u32 %s1542_s16, 6 }
   0xf   : > { %s199_s20 = scalar_lea.vmem %s1536_s0, %s928_s17  ;;  %s1185_s17 = smov 56  }
  0x10   : > { %v946_v1 = vld [vmem:[%s199_s20 + $0x8] sm:$0xff]   ;;  %v931_v2 = vld [vmem:[%s199_s20] sm:$0xff]   ;;  %v947_v3 = vld [vmem:[%s199_s20 + $0x10] sm:$0xff]   ;;  %s1494_s22 = scalar_lea.vmem %s1539_s3, %s929_s19  ;;  %s914_s23 = sshll.u32 %s1542_s16, 1 }
  0x11   : > { %v936_v4 = vunpack.c.l.bf16 %v946_v1  ;;  %v937_v5 = vunpack.c.h.bf16 %v946_v1  ;;  %v932_v6 = vunpack.c.l.bf16 %v931_v2  ;;  %v933_v7 = vunpack.c.h.bf16 %v931_v2  ;;  %v1246_v25 = vld [vmem:[%s199_s20 + $0x18] sm:$0xff]   ;;  %v1165_v2 = vld [vmem:[%s1538_s2] sm:$0xff]   ;;  %s208_s26 = scalar_lea.vmem %s1540_s4, %s914_s23 }
  0x12   : > { %v940_v9 = vunpack.c.l.bf16 %v947_v3  ;;  %v941_v20 = vunpack.c.h.bf16 %v947_v3  ;;  %v944_v35 = vunpack.c.l.bf16 %v1246_v25  ;;  %958 = vmatprep.subr.bf16.mxu0 %v1165_v2  ;;  %976 = vmatprep.subr.bf16.mxu1 %v1165_v2 }
  0x13   : > { %v234_v10 = vmul.f32 %v936_v4, %v1229_v0  ;;  %v235_v11 = vmul.f32 %v937_v5, %v1229_v0  ;;  %v232_v12 = vmul.f32 %v932_v6, %v1229_v0  ;;  %v233_v13 = vmul.f32 %v933_v7, %v1229_v0  ;;  %959 = vmatpush3.bf16.msra.mxu0 %v1165_v2 }
  0x14   : > { %v236_v14 = vmul.f32 %v940_v9, %v1229_v0  ;;  %v237_v36 = vmul.f32 %v941_v20, %v1229_v0  ;;  %v238_v60 = vmul.f32 %v944_v35, %v1229_v0  ;;  %981 = vmatpush3.bf16.msra.mxu1 %v1165_v2 }
  0x15   : > { %v246_v15 = vadd.f32 %v1234_v8, %v234_v10  ;;  %v247_v16 = vadd.f32 %v1234_v8, %v235_v11  ;;  %v244_v17 = vadd.f32 %v1234_v8, %v232_v12  ;;  %v245_v18 = vadd.f32 %v1234_v8, %v233_v13 }
  0x16   : > { %v248_v19 = vadd.f32 %v1234_v8, %v236_v14  ;;  %v249_v1 = vadd.f32 %v1234_v8, %v237_v36  ;;  %v250_v13 = vadd.f32 %v1234_v8, %v238_v60  ;;  %v1166_v14 = vld [vmem:[%s1538_s2 + $0x8] sm:$0xff]   ;;  %v1168_v36 = vld [vmem:[%s1538_s2 + $0x18] sm:$0xff]  }
  0x17   : > { %v254_v21 = vmax.f32 %v246_v15, 0.0  ;;  %v255_v22 = vmax.f32 %v247_v16, 0.0  ;;  %v252_v23 = vmax.f32 %v244_v17, 0.0  ;;  %v253_v24 = vmax.f32 %v245_v18, 0.0  ;;  %960 = vmatprep.subr.bf16.mxu0 %v1166_v14  ;;  %977 = vmatprep.subr.bf16.mxu1 %v1166_v14 }
  0x18   : > { %v256_v26 = vmax.f32 %v248_v19, 0.0  ;;  %v257_v20 = vmax.f32 %v249_v1, 0.0  ;;  %961 = vmatpush3.bf16.msra.mxu0 %v1166_v14  ;;  %982 = vmatpush3.bf16.msra.mxu1 %v1166_v14 }
  0x19   : > { %v270_v29 = vrot.slane %v254_v21, 7  ;;  %v271_v30 = vrot.slane %v255_v22, 7  ;;  %v268_v31 = vrot.slane %v252_v23, 7  ;;  %v269_v32 = vrot.slane %v253_v24, 7  ;;  %v1167_v24 = vld [vmem:[%s1538_s2 + $0x10] sm:$0xff]  }
  0x1a   : > { %v1251_v33 = vrot.slane %v256_v26, 7  ;;  %v258_v22 = vmax.f32 %v250_v13, 0.0  ;;  %v945_v23 = vunpack.c.h.bf16 %v1246_v25  ;;  %962 = vmatprep.subr.bf16.mxu0 %v1167_v24  ;;  %978 = vmatprep.subr.bf16.mxu1 %v1167_v24 }
  0x1b   : > { %v1259_v37 = vsel %vm284_vm0, 0.0, %v270_v29  ;;  %v1262_v38 = vsel %vm284_vm0, 0.0, %v271_v30  ;;  %v1265_v39 = vsel %vm284_vm0, 0.0, %v268_v31  ;;  %v1268_v40 = vsel %vm284_vm0, 0.0, %v269_v32 }
  0x1c   : > { %v1010_v41 = vpack.i.bf16 %v1262_v38, %v1259_v37  ;;  %v293_v42 = vsel %vm284_vm0, %v268_v31, 0.0  ;;  %v1005_v43 = vpack.i.bf16 %v1268_v40, %v1265_v39  ;;  %v1277_v44 = vsel %vm284_vm0, 0.0, %v1251_v33  ;;  %963 = vmatpush3.bf16.msra.mxu0 %v1167_v24  ;;  %983 = vmatpush3.bf16.msra.mxu1 %v1167_v24 }
  0x1d   : > { %v1020_v45 = vpack.i.bf16 %v1277_v44, %v1262_v38  ;;  %v1015_v46 = vpack.i.bf16 %v1259_v37, %v1268_v40  ;;  %v367_v47 = vrot.slane %v1265_v39, 2  ;;  %v368_v48 = vrot.slane %v293_v42, 2  ;;  %964 = vmatprep.subr.bf16.mxu0 %v1168_v36  ;;  %979 = vmatprep.subr.bf16.mxu1 %v1168_v36 }
  0x1e   : > { %1011 = vrot.lane.b32.xlu1 %v1010_v41, %s1179_s25  ;;  %1006 = vrot.lane.b32.xlu0 %v1005_v43, %s1179_s25  ;;  %v319_v49 = vrot.slane %v1265_v39, 1  ;;  %v320_v50 = vrot.slane %v293_v42, 1  ;;  %v294_v51 = vsel %vm284_vm0, %v269_v32, 0.0  ;;  %v295_v52 = vsel %vm284_vm0, %v270_v29, 0.0 }
  0x1f   : > { %v1290_v53 = vsel %vm364_vm1, %v367_v47, %v368_v48  ;;  %v370_v54 = vrot.slane %v1268_v40, 2  ;;  %v371_v55 = vrot.slane %v294_v51, 2  ;;  %v373_v56 = vrot.slane %v1259_v37, 2 }
  0x20   : > { %v321_v57 = vsel %vm316_vm2, %v319_v49, %v320_v50  ;;  %v374_v58 = vrot.slane %v295_v52, 2  ;;  %v322_v59 = vrot.slane %v1268_v40, 1  ;;  %v1035_v61 = vpack.i.bf16 %v1290_v53, %v1249_v28  ;;  %965 = vmatpush3.bf16.msra.mxu0 %v1168_v36  ;;  %984 = vmatpush3.bf16.msra.mxu1 %v1168_v36 }
  0x21   : > { %v323_v62 = vrot.slane %v294_v51, 1  ;;  %v325_v63 = vrot.slane %v1259_v37, 1  ;;  %v1025_v3 = vpack.i.bf16 %v321_v57, %v1254_v34  ;;  %v1308_v4 = vsel %vm364_vm1, %v370_v54, %v371_v55 }
  0x22   : > { %1021 = vrot.lane.b32.xlu1 %v1020_v45, %s1180_s28  ;;  %1016 = vrot.lane.b32.xlu0 %v1015_v46, %s1180_s28  ;;  %v326_v5 = vrot.slane %v295_v52, 1  ;;  %v296_v6 = vsel %vm284_vm0, %v271_v30, 0.0  ;;  %v375_v7 = vsel %vm364_vm1, %v373_v56, %v374_v58  ;;  %v328_v10 = vrot.slane %v1262_v38, 1  ;;  %v1169_v52 = vld [vmem:[%s1538_s2 + $0x20] ss:$0 sps:$4 sm:$0xff]  }
  0x23   : > { %v324_v9 = vsel %vm316_vm2, %v322_v59, %v323_v62  ;;  %v329_v11 = vrot.slane %v296_v6, 1  ;;  %v1322_v15 = vpack.i.bf16 %v375_v7, %v1308_v4  ;;  %v376_v18 = vrot.slane %v1262_v38, 2  ;;  %986 = vmatprep.subr.msk.bf16.mxu0 %vm689_vm3, %v1169_v52  ;;  %987 = vmatprep.subr.msk.bf16.mxu1 %vm689_vm3, %v1169_v52 }
  0x24   : > { %v327_v12 = vsel %vm316_vm2, %v325_v63, %v326_v5  ;;  %v377_v19 = vrot.slane %v296_v6, 2  ;;  %v297_v21 = vsel %vm284_vm0, %v1251_v33, 0.0  ;;  %v1045_v29 = vpack.i.bf16 %v324_v9, %v321_v57 }
  0x25   : > { %v1030_v16 = vpack.i.bf16 %v327_v12, %v324_v9  ;;  %v330_v17 = vsel %vm316_vm2, %v328_v10, %v329_v11  ;;  %v331_v31 = vrot.slane %v1277_v44, 1  ;;  %v332_v32 = vrot.slane %v297_v21, 1 }
  0x26   : > { %1036 = vrot.lane.b32.xlu1 %v1035_v61, %s1181_s5  ;;  %1026 = vrot.lane.b32.xlu0 %v1025_v3, %s1182_s6  ;;  %v1050_v26 = vpack.i.bf16 %v330_v17, %v327_v12  ;;  %v378_v30 = vsel %vm364_vm1, %v376_v18, %v377_v19  ;;  %v273_v33 = vrot.slane %v257_v20, 7  ;;  %v274_v25 = vrot.slane %v258_v22, 7 }
  0x27   : > { %v239_v35 = vmul.f32 %v945_v23, %v1229_v0  ;;  %v1060_v41 = vpack.i.bf16 %v378_v30, %v375_v7  ;;  %v1055_v42 = vpack.i.bf16 %v1308_v4, %v1290_v53  ;;  %v1346_v43 = vsel %vm316_vm2, %v331_v31, %v332_v32 }
  0x28   : > { %v1349_v0 = vsel %vm284_vm0, 0.0, %v273_v33  ;;  %v298_v45 = vsel %vm284_vm0, %v273_v33, 0.0  ;;  %v1353_v46 = vsel %vm284_vm0, 0.0, %v274_v25  ;;  %v299_v47 = vsel %vm284_vm0, %v274_v25, 0.0 }
  0x29   : > { %v251_v48 = vadd.f32 %v1234_v8, %v239_v35  ;;  %v1070_v49 = vpack.i.bf16 %v1346_v43, %v330_v17  ;;  %v334_v50 = vrot.slane %v1349_v0, 1  ;;  %v335_v51 = vrot.slane %v298_v45, 1 }
  0x2a   : > { %1041 = vrot.lane.b32.xlu1 %v1322_v15, %s1181_s5  ;;  %1031 = vrot.lane.b32.xlu0 %v1030_v16, %s1182_s6  ;;  %v337_v53 = vrot.slane %v1353_v46, 1  ;;  %v338_v54 = vrot.slane %v299_v47, 1  ;;  %v379_v8 = vrot.slane %v1277_v44, 2  ;;  %v380_v55 = vrot.slane %v297_v21, 2 }
  0x2b   : > { %v259_v56 = vmax.f32 %v251_v48, 0.0  ;;  %v336_v57 = vsel %vm316_vm2, %v334_v50, %v335_v51  ;;  %v382_v58 = vrot.slane %v1349_v0, 2  ;;  %v383_v59 = vrot.slane %v298_v45, 2 }
  0x2c   : > { %v691_v60 = vsel %vm689_vm3, %v1169_v52, 0  ;;  %v339_v61 = vsel %vm316_vm2, %v337_v53, %v338_v54  ;;  %v381_v62 = vsel %vm364_vm1, %v379_v8, %v380_v55  ;;  %v385_v63 = vrot.slane %v1353_v46, 2 }
  0x2d   : > { %v386_v1 = vrot.slane %v299_v47, 2  ;;  %v275_v2 = vrot.slane %v259_v56, 7  ;;  %967 = vmatpush3.bf16.msra.mxu0 %v691_v60  ;;  %985 = vmatpush3.bf16.msra.mxu1 %v691_v60  ;;  %v1090_v3 = vpack.i.bf16 %v339_v61, %v336_v57  ;;  %v1085_v4 = vpack.i.bf16 %v381_v62, %v378_v30 }
  0x2e   : > { %1051 = vrot.lane.b32.xlu1 %v1050_v26, %s1183_s11  ;;  %1046 = vrot.lane.b32.xlu0 %v1045_v29, %s1183_s11  ;;  %v384_v5 = vsel %vm364_vm1, %v382_v58, %v383_v59  ;;  %v1105_v14 = vpack.i.bf16 %v1349_v0, %v1277_v44  ;;  %v1115_v19 = vpack.i.bf16 %v336_v57, %v1346_v43 }
  0x2f   : > { %v387_v6 = vsel %vm364_vm1, %v385_v63, %v386_v1  ;;  %v292_v7 = vsel %vm284_vm0, 0.0, %v275_v2  ;;  %v300_v9 = vsel %vm284_vm0, %v275_v2, 0.0  ;;  %v1125_v22 = vpack.i.bf16 %v384_v5, %v381_v62 }
  0x30   : > { %v1100_v10 = vpack.i.bf16 %v387_v6, %v384_v5  ;;  %v438_v11 = vrot.slane %v292_v7, 1  ;;  %v439_v12 = vrot.slane %v300_v9, 1  ;;  %v1110_v13 = vpack.i.bf16 %v292_v7, %v1353_v46 }
  0x31   : > { %v466_v17 = vrot.slane %v300_v9, 2  ;;  %v1140_v23 = vpack.i.bf16 %v1178_v27, %v292_v7  ;;  %v1135_v24 = vpack.i.bf16 %v1353_v46, %v1349_v0 }
  0x32   : > { %1061 = vrot.lane.b32.xlu1 %v1060_v41, %s1184_s12  ;;  %1056 = vrot.lane.b32.xlu0 %v1055_v42, %s1184_s12 }
  0x36   : > { %1071 = vrot.lane.b32.xlu1 %v1070_v49, %s1185_s17  ;;  %1066 = vrot.lane.b32.xlu0 %v1030_v16, %s1185_s17  ;;  %v465_v16 = vrot.slane %v292_v7, 2 }
  0x38   : > { %v467_v20 = vsel %vm364_vm1, %v465_v16, %v466_v17 }
  0x39   : > { %v1130_v21 = vpack.i.bf16 %v467_v20, %v387_v6  ;;  %v1160_v29 = vpack.i.bf16 %v1249_v28, %v467_v20 }
  0x3a   : > { %1081 = vrot.lane.b32.xlu1 %v1070_v49, %s1182_s6  ;;  %1076 = vrot.lane.b32.xlu0 %v1322_v15, %s1186_s18  ;;  %v440_v15 = vsel %vm316_vm2, %v438_v11, %v439_v12 }
  0x3b   : > { %v1120_v18 = vpack.i.bf16 %v440_v15, %v339_v61  ;;  %v1150_v26 = vpack.i.bf16 %v1254_v34, %v440_v15 }
  0x3e   : > { %1091 = vrot.lane.b32.xlu1 %v1090_v3, %s1182_s6  ;;  %1086 = vrot.lane.b32.xlu0 %v1085_v4, %s1186_s18 }
  0x42   : > { %1101 = vrot.lane.b32.xlu1 %v1100_v10, %s1181_s5  ;;  %1096 = vrot.lane.b32.xlu0 %v1085_v4, %s1181_s5 }
  0x46   : > { %1111 = vrot.lane.b32.xlu1 %v1110_v13, %s1179_s25  ;;  %1106 = vrot.lane.b32.xlu0 %v1105_v14, %s1179_s25 }
  0x4a   : > { %1121 = vrot.lane.b32.xlu1 %v1120_v18, %s1183_s11  ;;  %1116 = vrot.lane.b32.xlu0 %v1115_v19, %s1183_s11 }
  0x4e   : > { %1131 = vrot.lane.b32.xlu1 %v1130_v21, %s1184_s12  ;;  %1126 = vrot.lane.b32.xlu0 %v1125_v22, %s1184_s12 }
  0x52   : > { %1141 = vrot.lane.b32.xlu1 %v1140_v23, %s1180_s28  ;;  %1136 = vrot.lane.b32.xlu0 %v1135_v24, %s1180_s28 }
  0x56   : > { %1151 = vrot.lane.b32.xlu1 %v1150_v26, %s1185_s17  ;;  %1146 = vrot.lane.b32.xlu0 %v1090_v3, %s1185_s17 }
  0x5a   : > { %1161 = vrot.lane.b32.xlu1 %v1160_v29, %s1186_s18  ;;  %1156 = vrot.lane.b32.xlu0 %v1100_v10, %s1186_s18 }
  0x90   : > { %v1012_v27 = vpop.permute.xlu1 %1011  ;;  %v1007_v30 = vpop.permute.xlu0 %1006 }
  0x91   : > { %v1009_v8 = vunpack.i.h.bf16 %v1007_v30  ;;  %v1008_v55 = vunpack.i.l.bf16 %v1007_v30  ;;  %v1014_v62 = vunpack.i.h.bf16 %v1012_v27  ;;  %v1013_v63 = vunpack.i.l.bf16 %v1012_v27 }
  0x94   : > { %v1407_v31 = vpop.permute.xlu1 %1021  ;;  %v1409_v32 = vpop.permute.xlu0 %1016 }
  0x95   : > { %v1019_v19 = vunpack.i.h.bf16 %v1409_v32  ;;  %v1018_v20 = vunpack.i.l.bf16 %v1409_v32 }
  0x98   : > { %v1037_v33 = vpop.permute.xlu1 %1036  ;;  %v1027_v25 = vpop.permute.xlu0 %1026 }
  0x99   : > { %v1029_v36 = vunpack.i.h.bf16 %v1027_v25  ;;  %v1028_v41 = vunpack.i.l.bf16 %v1027_v25  ;;  %v1039_v28 = vunpack.i.h.bf16 %v1037_v33  ;;  %v1038_v45 = vunpack.i.l.bf16 %v1037_v33 }
  0x9b   : > { %v566_v49 = vsel %vm564_vm4, %v1265_v39, %v1029_v36  ;;  %v565_v50 = vsel %vm564_vm4, 0.0, %v1028_v41  ;;  %v1024_v41 = vunpack.i.h.bf16 %v1407_v31 }
  0x9c   : > { %v1042_v35 = vpop.permute.xlu1 %1041  ;;  %v1032_v34 = vpop.permute.xlu0 %1031  ;;  %v575_v56 = vsel %vm573_vm5, %v566_v49, %v1039_v28  ;;  %v574_v57 = vsel %vm573_vm5, %v565_v50, %v1038_v45 }
  0x9d   : > { %v1034_v42 = vunpack.i.h.bf16 %v1032_v34  ;;  %v1033_v43 = vunpack.i.l.bf16 %v1032_v34  ;;  %v1044_v51 = vunpack.i.h.bf16 %v1042_v35  ;;  %v1043_v52 = vunpack.i.l.bf16 %v1042_v35 }
  0x9e   : > { %v583_v2 = vsel %vm582_vm6, %v574_v57, %v1008_v55  ;;  %v584_v5 = vsel %vm582_vm6, %v575_v56, %v1009_v8 }
  0x9f   : > { %v568_v53 = vsel %vm564_vm4, %v1259_v37, %v1034_v42  ;;  %v567_v54 = vsel %vm564_vm4, %v1268_v40, %v1033_v43  ;;  %v1023_v42 = vunpack.i.l.bf16 %v1407_v31 }
  0xa0   : > { %v1052_v47 = vpop.permute.xlu1 %1051  ;;  %v1047_v48 = vpop.permute.xlu0 %1046  ;;  %v577_v59 = vsel %vm573_vm5, %v568_v53, %v1044_v51  ;;  %v576_v60 = vsel %vm573_vm5, %v567_v54, %v1043_v52 }
  0xa1   : > { %v1049_v61 = vunpack.i.h.bf16 %v1047_v48  ;;  %v1048_v37 = vunpack.i.l.bf16 %v1047_v48  ;;  %v1054_v3 = vunpack.i.h.bf16 %v1052_v47  ;;  %v1053_v4 = vunpack.i.l.bf16 %v1052_v47 }
  0xa2   : > { %v585_v6 = vsel %vm582_vm6, %v576_v60, %v1013_v63  ;;  %v586_v7 = vsel %vm582_vm6, %v577_v59, %v1014_v62 }
  0xa3   : > { %v592_v13 = vsel %vm591_vm7, %v583_v2, %v1048_v37  ;;  %v593_v14 = vsel %vm591_vm7, %v584_v5, %v1049_v61  ;;  %v594_v21 = vsel %vm591_vm7, %v585_v6, %v1053_v4  ;;  %v595_v22 = vsel %vm591_vm7, %v586_v7, %v1054_v3 }
  0xa4   : > { %v1062_v39 = vpop.permute.xlu1 %1061  ;;  %v1057_v58 = vpop.permute.xlu0 %1056 }
  0xa5   : > { %v1059_v40 = vunpack.i.h.bf16 %v1057_v58  ;;  %v1058_v1 = vunpack.i.l.bf16 %v1057_v58  ;;  %v1064_v9 = vunpack.i.h.bf16 %v1062_v39  ;;  %v1063_v10 = vunpack.i.l.bf16 %v1062_v39 }
  0xa7   : > { %v601_v15 = vsel %vm600_vm8, %v592_v13, %v1058_v1  ;;  %v602_v16 = vsel %vm600_vm8, %v593_v14, %v1059_v40  ;;  %v603_v23 = vsel %vm600_vm8, %v594_v21, %v1063_v10  ;;  %v604_v24 = vsel %vm600_vm8, %v595_v22, %v1064_v9 }
  0xa8   : > { %v1072_v11 = vpop.permute.xlu1 %1071  ;;  %v1067_v12 = vpop.permute.xlu0 %1066  ;;  %v610_v33 = vsel %vm609_vm9, %v601_v15, %v1018_v20  ;;  %v611_v25 = vsel %vm609_vm9, %v602_v16, %v1019_v19  ;;  %v612_v49 = vsel %vm609_vm9, %v603_v23, %v1023_v42  ;;  %v613_v50 = vsel %vm609_vm9, %v604_v24, %v1024_v41 }
  0xa9   : > { %v1069_v17 = vunpack.i.h.bf16 %v1067_v12  ;;  %v1068_v18 = vunpack.i.l.bf16 %v1067_v12  ;;  %v1074_v35 = vunpack.i.h.bf16 %v1072_v11  ;;  %v1073_v32 = vunpack.i.l.bf16 %v1072_v11 }
  0xab   : > { %v619_v34 = vsel %vm618_vm10, %v610_v33, %v1068_v18  ;;  %v620_v36 = vsel %vm618_vm10, %v611_v25, %v1069_v17  ;;  %v621_v53 = vsel %vm618_vm10, %v612_v49, %v1073_v32  ;;  %v622_v54 = vsel %vm618_vm10, %v613_v50, %v1074_v35 }
  0xac   : > { %v1082_v26 = vpop.permute.xlu1 %1081  ;;  %v1077_v29 = vpop.permute.xlu0 %1076 }
  0xad   : > { %v1079_v27 = vunpack.i.h.bf16 %v1077_v29  ;;  %v1078_v30 = vunpack.i.l.bf16 %v1077_v29  ;;  %v1084_v61 = vunpack.i.h.bf16 %v1082_v26  ;;  %v1083_v37 = vunpack.i.l.bf16 %v1082_v26 }
  0xaf   : > { %v628_v43 = vsel %vm627_vm11, %v619_v34, %v1078_v30  ;;  %v629_v28 = vsel %vm627_vm11, %v620_v36, %v1079_v27  ;;  %v570_v11 = vsel %vm564_vm4, %v1277_v44, %v1084_v61  ;;  %v569_v12 = vsel %vm564_vm4, %v1262_v38, %v1083_v37 }
  0xb0   : > { %v1092_v45 = vpop.permute.xlu1 %1091  ;;  %v1087_v47 = vpop.permute.xlu0 %1086  ;;  %v636_v48 = vpack.c.bf16 %v629_v28, %v628_v43 }
  0xb1   : > { %v1089_v51 = vunpack.i.h.bf16 %v1087_v47  ;;  %v1088_v52 = vunpack.i.l.bf16 %v1087_v47  ;;  %v1094_v62 = vunpack.i.h.bf16 %v1092_v45  ;;  %v1093_v63 = vunpack.i.l.bf16 %v1092_v45 }
  0xb2   : > { %968 = vmatprep.mubr.msk.bf16.mxu0 %vm676_vm12, %v636_v48 }
  0xb3   : > { %v630_v31 = vsel %vm627_vm11, %v621_v53, %v1088_v52  ;;  %v631_v8 = vsel %vm627_vm11, %v622_v54, %v1089_v51  ;;  %v572_v13 = vsel %vm564_vm4, %v1353_v46, %v1094_v62  ;;  %v571_v14 = vsel %vm564_vm4, %v1349_v0, %v1093_v63 }
  0xb4   : > { %v637_v55 = vpack.c.bf16 %v631_v8, %v630_v31  ;;  %v1102_v56 = vpop.permute.xlu1 %1101  ;;  %v1097_v57 = vpop.permute.xlu0 %1096 }
  0xb5   : > { %v1104_v40 = vunpack.i.h.bf16 %v1102_v56  ;;  %v1103_v1 = vunpack.i.l.bf16 %v1102_v56  ;;  %v1099_v2 = vunpack.i.h.bf16 %v1097_v57  ;;  %v1098_v3 = vunpack.i.l.bf16 %v1097_v57 }
  0xb6   : > { %969 = vmatmul.mubr.msk.bf16.vlgmr.msra.gmra.mrb[0].mxu0 %vm676_vm12, %v637_v55 }
  0xb7   : > { %v580_v15 = vsel %vm573_vm5, %v571_v14, %v1103_v1  ;;  %v581_v16 = vsel %vm573_vm5, %v572_v13, %v1104_v40  ;;  %v579_v17 = vsel %vm573_vm5, %v570_v11, %v1099_v2  ;;  %v578_v18 = vsel %vm573_vm5, %v569_v12, %v1098_v3 }
  0xb8   : > { %v1112_v39 = vpop.permute.xlu1 %1111  ;;  %v1107_v58 = vpop.permute.xlu0 %1106 }
  0xb9   : > { %v1114_v6 = vunpack.i.h.bf16 %v1112_v39  ;;  %v1113_v7 = vunpack.i.l.bf16 %v1112_v39  ;;  %v1109_v9 = vunpack.i.h.bf16 %v1107_v58  ;;  %v1108_v10 = vunpack.i.l.bf16 %v1107_v58 }
  0xbb   : > { %v589_v23 = vsel %vm582_vm6, %v580_v15, %v1113_v7  ;;  %v590_v46 = vsel %vm582_vm6, %v581_v16, %v1114_v6  ;;  %v587_v0 = vsel %vm582_vm6, %v578_v18, %v1108_v10  ;;  %v588_v24 = vsel %vm582_vm6, %v579_v17, %v1109_v9 }
  0xbc   : > { %v1122_v59 = vpop.permute.xlu1 %1121  ;;  %v1117_v60 = vpop.permute.xlu0 %1116 }
  0xbd   : > { %v1124_v44 = vunpack.i.h.bf16 %v1122_v59  ;;  %v1123_v21 = vunpack.i.l.bf16 %v1122_v59  ;;  %v1119_v22 = vunpack.i.h.bf16 %v1117_v60  ;;  %v1118_v38 = vunpack.i.l.bf16 %v1117_v60 }
  0xbf   : > { %v598_v41 = vsel %vm591_vm7, %v589_v23, %v1123_v21  ;;  %v599_v42 = vsel %vm591_vm7, %v590_v46, %v1124_v44  ;;  %v596_v43 = vsel %vm591_vm7, %v587_v0, %v1118_v38  ;;  %v597_v28 = vsel %vm591_vm7, %v588_v24, %v1119_v22 }
  0xc0   : > { %v1132_v4 = vpop.permute.xlu1 %1131  ;;  %v1127_v5 = vpop.permute.xlu0 %1126 }
  0xc1   : > { %v1134_v26 = vunpack.i.h.bf16 %v1132_v4  ;;  %v1133_v29 = vunpack.i.l.bf16 %v1132_v4  ;;  %v1129_v27 = vunpack.i.h.bf16 %v1127_v5  ;;  %v1128_v30 = vunpack.i.l.bf16 %v1127_v5 }
  0xc3   : > { %v607_v50 = vsel %vm600_vm8, %v598_v41, %v1133_v29  ;;  %v608_v51 = vsel %vm600_vm8, %v599_v42, %v1134_v26  ;;  %v605_v52 = vsel %vm600_vm8, %v596_v43, %v1128_v30  ;;  %v606_v53 = vsel %vm600_vm8, %v597_v28, %v1129_v27 }
  0xc4   : > { %v1142_v19 = vpop.permute.xlu1 %1141  ;;  %v1137_v20 = vpop.permute.xlu0 %1136 }
  0xc5   : > { %v1144_v33 = vunpack.i.h.bf16 %v1142_v19  ;;  %v1143_v25 = vunpack.i.l.bf16 %v1142_v19  ;;  %v1139_v35 = vunpack.i.h.bf16 %v1137_v20  ;;  %v1138_v32 = vunpack.i.l.bf16 %v1137_v20 }
  0xc7   : > { %v616_v54 = vsel %vm609_vm9, %v607_v50, %v1143_v25  ;;  %v617_v31 = vsel %vm609_vm9, %v608_v51, %v1144_v33  ;;  %v614_v8 = vsel %vm609_vm9, %v605_v52, %v1138_v32  ;;  %v615_v55 = vsel %vm609_vm9, %v606_v53, %v1139_v35 }
  0xc8   : > { %v1152_v34 = vpop.permute.xlu1 %1151  ;;  %v1147_v36 = vpop.permute.xlu0 %1146 }
  0xc9   : > { %v1154_v45 = vunpack.i.h.bf16 %v1152_v34  ;;  %v1153_v47 = vunpack.i.l.bf16 %v1152_v34  ;;  %v1149_v48 = vunpack.i.h.bf16 %v1147_v36  ;;  %v1148_v49 = vunpack.i.l.bf16 %v1147_v36 }
  0xcb   : > { %v625_v61 = vsel %vm618_vm10, %v616_v54, %v1153_v47  ;;  %v626_v37 = vsel %vm618_vm10, %v617_v31, %v1154_v45  ;;  %v623_v62 = vsel %vm618_vm10, %v614_v8, %v1148_v49  ;;  %v624_v63 = vsel %vm618_vm10, %v615_v55, %v1149_v48 }
  0xcc   : > { %v1162_v56 = vpop.permute.xlu1 %1161  ;;  %v1157_v57 = vpop.permute.xlu0 %1156 }
  0xcd   : > { %v1164_v39 = vunpack.i.h.bf16 %v1162_v56  ;;  %v1163_v58 = vunpack.i.l.bf16 %v1162_v56  ;;  %v1159_v59 = vunpack.i.h.bf16 %v1157_v57  ;;  %v1158_v60 = vunpack.i.l.bf16 %v1157_v57 }
  0xcf   : > { %v634_v40 = vsel %vm627_vm11, %v625_v61, %v1163_v58  ;;  %v635_v1 = vsel %vm627_vm11, %v626_v37, %v1164_v39  ;;  %v632_v2 = vsel %vm627_vm11, %v623_v62, %v1158_v60  ;;  %v633_v3 = vsel %vm627_vm11, %v624_v63, %v1159_v59 }
  0xd0   : > { %v639_v4 = vpack.c.bf16 %v635_v1, %v634_v40  ;;  %v638_v5 = vpack.c.bf16 %v633_v3, %v632_v2 }
  0xd2   : > { %972 = vmatprep.mubr.msk.bf16.mxu1 %vm676_vm12, %v638_v5 }
  0xd3   : > { %973 = vmatmul.mubr.msk.bf16.vlgmr.msra.gmra.mrb[0].mxu1 %vm676_vm12, %v639_v4 }
 0x189   : > { %v970_v6 = vpop.f32.mrb[0].mxu0 }
 0x18a   : > { %760 = vst.msk [vmem:[%s1494_s22 + $0x10] sm:$0xff] %vm564_vm4, %v970_v6  ;;  %v727_v7 = vpop.f32.mrb[1].mxu0  ;;  %v789_v12 = vmul.f32 %v970_v6, %v970_v6  ;;  %v769_v17 = vsel %vm564_vm4, %v970_v6, 0.0 }
 0x18b   : > { %758 = vst.msk [vmem:[%s1494_s22] sm:$0xff] %vm564_vm4, %v727_v7  ;;  %v787_v9 = vmul.f32 %v727_v7, %v727_v7  ;;  %v971_v10 = vpop.f32.mrb[2].mxu0  ;;  %v766_v13 = vsel %vm564_vm4, %v727_v7, 0.0 }
 0x18c   : > { %761 = vst.msk [vmem:[%s1494_s22 + $0x18] sm:$0xff] %vm564_vm4, %v971_v10  ;;  %v730_v11 = vpop.f32.mrb[3].mxu0  ;;  %v790_v19 = vmul.f32 %v971_v10, %v971_v10  ;;  %v798_v22 = vsel %vm564_vm4, %v789_v12, 0.0  ;;  %v771_v38 = vsel %vm564_vm4, %v971_v10, 0.0 }
 0x18d   : > { %759 = vst.msk [vmem:[%s1494_s22 + $0x8] sm:$0xff] %vm564_vm4, %v730_v11  ;;  %v767_v14 = vsel %vm564_vm4, %v730_v11, 0.0  ;;  %v788_v15 = vmul.f32 %v730_v11, %v730_v11  ;;  %v795_v18 = vsel %vm564_vm4, %v787_v9, 0.0 }
 0x18e   : > { %v768_v16 = vadd.f32 %v767_v14, %v766_v13  ;;  %v800_v0 = vsel %vm564_vm4, %v790_v19, 0.0 }
 0x18f   : > { %v796_v20 = vsel %vm564_vm4, %v788_v15, 0.0 }
 0x190   : > { %v770_v44 = vadd.f32 %v769_v17, %v768_v16  ;;  %v797_v21 = vadd.f32 %v796_v20, %v795_v18 }
 0x192   : > { %v799_v23 = vadd.f32 %v798_v22, %v797_v21  ;;  %v772_v46 = vadd.f32 %v771_v38, %v770_v44 }
 0x194   : > { %v801_v24 = vadd.f32 %v800_v0, %v799_v23 }
 0x1a6   : > { %v974_v26 = vpop.f32.mrb[0].mxu1 }
 0x1a7   : > { %764 = vst.msk [vmem:[%s1494_s22 + $0x30] sm:$0xff] %vm564_vm4, %v974_v26  ;;  %v743_v29 = vpop.f32.mrb[1].mxu1  ;;  %v793_v32 = vmul.f32 %v974_v26, %v974_v26  ;;  %v777_v28 = vsel %vm564_vm4, %v974_v26, 0.0 }
 0x1a8   : > { %762 = vst.msk [vmem:[%s1494_s22 + $0x20] sm:$0xff] %vm564_vm4, %v743_v29  ;;  %v773_v27 = vsel %vm564_vm4, %v743_v29, 0.0  ;;  %v791_v30 = vmul.f32 %v743_v29, %v743_v29  ;;  %v975_v33 = vpop.f32.mrb[2].mxu1 }
 0x1a9   : > { %v774_v25 = vadd.f32 %v773_v27, %v772_v46  ;;  %765 = vst.msk [vmem:[%s1494_s22 + $0x38] sm:$0xff] %vm564_vm4, %v975_v33  ;;  %v746_v35 = vpop.f32.mrb[3].mxu1  ;;  %v794_v45 = vmul.f32 %v975_v33, %v975_v33  ;;  %v806_v50 = vsel %vm564_vm4, %v793_v32, 0.0  ;;  %v779_v51 = vsel %vm564_vm4, %v975_v33, 0.0 }
 0x1aa   : > { %v802_v34 = vsel %vm564_vm4, %v791_v30, 0.0  ;;  %763 = vst.msk [vmem:[%s1494_s22 + $0x28] sm:$0xff] %vm564_vm4, %v746_v35  ;;  %v775_v36 = vsel %vm564_vm4, %v746_v35, 0.0  ;;  %v792_v41 = vmul.f32 %v746_v35, %v746_v35 }
 0x1ab   : > { %v803_v42 = vadd.f32 %v802_v34, %v801_v24  ;;  %v776_v43 = vadd.f32 %v775_v36, %v774_v25  ;;  %v808_v54 = vsel %vm564_vm4, %v794_v45, 0.0 }
 0x1ac   : > { %v804_v47 = vsel %vm564_vm4, %v792_v41, 0.0 }
 0x1ad   : > { %v778_v48 = vadd.f32 %v777_v28, %v776_v43  ;;  %v805_v49 = vadd.f32 %v804_v47, %v803_v42 }
 0x1af   : > { %v780_v52 = vadd.f32 %v779_v51, %v778_v48  ;;  %v807_v53 = vadd.f32 %v806_v50, %v805_v49 }
 0x1b1   : > { %v781_v31 = vrot.slane %v780_v52, 4  ;;  %v809_v8 = vadd.f32 %v808_v54, %v807_v53 }
 0x1b3   : > { %v782_v55 = vadd.f32 %v781_v31, %v780_v52  ;;  %v810_v56 = vrot.slane %v809_v8, 4 }
 0x1b5   : > { %v783_v57 = vrot.slane %v782_v55, 2  ;;  %v811_v39 = vadd.f32 %v810_v56, %v809_v8 }
 0x1b7   : > { %v784_v58 = vadd.f32 %v783_v57, %v782_v55  ;;  %v812_v59 = vrot.slane %v811_v39, 2 }
 0x1b9   : > { %v785_v60 = vrot.slane %v784_v58, 1  ;;  %v813_v61 = vadd.f32 %v812_v59, %v811_v39 }
 0x1bb   : > { %v814_v37 = vrot.slane %v813_v61, 1  ;;  %v786_v62 = vadd.f32 %v785_v60, %v784_v58 }
 0x1bd   : > { %v815_v63 = vadd.f32 %v814_v37, %v813_v61 }
 0x1bf   : > { %v816_v40 = vsel %vm284_vm0, %v786_v62, %v815_v63 }
 0x1c0   : > { %818 = vst.msk [vmem:[%s208_s26] sm:$0x3] %vm817_vm13, %v816_v40 }
 0x1c1 PF: > { %s15_s15 = sadd.s32 1, %s1176_s15  }
 0x1c2   : > { %p12_p4 = scmp.ge.s32.totalorder %s15_s15, 4  }
 0x1c4   :  { %14 = sbr.rel (!%p12_p4) target bundleno = 1 (0x1), region = 74 }

// kernel: first_sub_block_forward.5
= control target key start
LH: loop header
LB: loop body
LE: loop exit
PB: predicated region body
PF: predicated region fallthrough
CT: control target
= control target key end

     0   :  { %s313_s12 = smov 0   ;;  %s336_s0 = inlined_call_operand.vmem [shape: f32[2,1,512], index: 0, kind: input, shape index: {}, may-alias: {0,3}]   ;;  %s337_s1 = inlined_call_operand.vmem [shape: f32[2,1,512], index: 1, kind: input, shape index: {}]   ;;  %s338_s2 = inlined_call_operand.vmem [shape: f32[3,512], index: 2, kind: input, shape index: {}]   ;;  %s339_s3 = inlined_call_operand.vmem [shape: f32[2,1,512], index: 3, kind: output, shape index: {}, may-alias: {0,3}]  }
   0x1 LB: > { %s265_s13 = sadd.s32 4294967295, %s291_s12   ;;  %p269_p0 = scmp.ge.s32.totalorder %s291_s12, 1  ;;  %s291_s12 = sphi %s313_s12, %s13_s12  }
   0x2   : > { %p145_p1 = scmp.lt.s32.totalorder %s291_s12, 3 }
   0x4   : > { %p146_p2 = pnand %p269_p0, %p145_p1 }
   0x5   : > { %p171_p3 = scmp.lt.s32.totalorder (!%p146_p2), %s265_s13, 1  ;;  %v184_v0 = vld [vmem:[%s338_s2] ss:$4 sm:$0xf] (!%p146_p2)  ;;  %v195_v7 = vlaneseq (!%p146_p2) }
   0x6   : > { %149 = sbr.rel (%p146_p2) target bundleno = 27 (0x1b), region = 32  ;;  %v273_v1 = vld [vmem:[%s338_s2 + $0x1] ss:$4 sm:$0xf] (!%p146_p2) }
   0x7   : > { %v274_v6 = vld [vmem:[%s338_s2 + $0x2] ss:$4 sm:$0xf] (!%p146_p2)  ;;  %vm197_vm0 = vcmp.lt.s32.totalorder (!%p146_p2), %v195_v7, 512 }
   0xd   : > { %s341_s13 = smov (!%p171_p3, %s265_s13), 1 }
   0xe   : > { %s270_s16 = sshll.u32 %s341_s13, 2 }
   0xf   : > { %s174_s21 = scalar_lea.vmem %s336_s0, %s270_s16  ;;  %s178_s24 = scalar_lea.vmem %s337_s1, %s270_s16 }
  0x10   : > { %v183_v2 = vld [vmem:[%s174_s21] sm:$0xf]  ;;  %s182_s29 = scalar_lea.vmem %s339_s3, %s270_s16 }
  0x11   : > { %v186_v3 = vld [vmem:[%s178_s24] sm:$0xf]  ;;  %v185_v4 = vmul.f32 %v184_v0, %v183_v2 }
  0x12   : > { %v189_v5 = vmul.f32 %v273_v1, %v186_v3 }
  0x14   : > { %v190_v8 = vadd.f32 %v189_v5, %v185_v4 }
  0x16   : > { %v193_v9 = vadd.f32 %v274_v6, %v190_v8 }
  0x18   : > { %v194_v10 = vmax.f32 %v193_v9, 0.0 }
  0x1a   : > { %199 = vst.msk [vmem:[%s182_s29] sm:$0xf] %vm197_vm0, %v194_v10 }
  0x1b PF: > { %s13_s12 = sadd.s32 1, %s291_s12  }
  0x1c   : > { %p10_p4 = scmp.ge.s32.totalorder %s13_s12, 4  }
  0x1e   :  { %12 = sbr.rel (!%p10_p4) target bundleno = 1 (0x1), region = 67 }

// kernel: first_sub_block_forward.3
= control target key start
LH: loop header
LB: loop body
LE: loop exit
PB: predicated region body
PF: predicated region fallthrough
CT: control target
= control target key end

     0   :  { %s1354_s15 = smov 0   ;;  %s1751_s0 = inlined_call_operand.vmem [shape: bf16[2,36,9,4], index: 0, kind: input, shape index: {}]   ;;  %s1752_s1 = inlined_call_operand.vmem [shape: bf16[36,16], index: 1, kind: input, shape index: {}]   ;;  %s1753_s2 = inlined_call_operand.vmem [shape: bf16[2,8,8,8], index: 2, kind: output, shape index: {0}]   ;;  %s1754_s3 = inlined_call_operand.vmem [shape: f32[2,8,8,8], index: 3, kind: output, shape index: {1}]   ;;  %s1755_s4 = inlined_call_operand.vmem [shape: f32[2,4,8], index: 4, kind: output, shape index: {2}]  }
   0x1 LB: > { %s1080_s16 = sadd.s32 4294967295, %s1318_s15   ;;  %p1084_p0 = scmp.ge.s32.totalorder %s1318_s15, 1  ;;  %s1318_s15 = sphi %s1354_s15, %s15_s15  }
   0x2   : > { %p167_p1 = scmp.lt.s32.totalorder %s1318_s15, 3 }
   0x4   : > { %p168_p2 = pnand %p1084_p0, %p167_p1 }
   0x5   : > { %p202_p3 = scmp.lt.s32.totalorder (!%p168_p2), %s1080_s16, 1  ;;  %vm372_vm0 = vcmask (!%p168_p2), 1046528   ;;  %s1320_s21 = smov (!%p168_p2), 12   ;;  %vm728_vm1 = vcmask (!%p168_p2), 1041408   ;;  %vm619_vm2 = vcmask (!%p168_p2), 31744   ;;  %vm628_vm3 = vcmask (!%p168_p2), 64512  }
   0x6   : > { %171 = sbr.rel (%p168_p2) target bundleno = 561 (0x231), region = 28  ;;  %s1321_s22 = smov (!%p168_p2), 4   ;;  %vm637_vm4 = vcmask (!%p168_p2), 97280   ;;  %vm646_vm5 = vcmask (!%p168_p2), 130048   ;;  %vm655_vm6 = vcmask (!%p168_p2), 162816   ;;  %vm664_vm7 = vcmask (!%p168_p2), 195584  }
   0x7   : > { %s1322_s23 = smov (!%p168_p2), 16   ;;  %s1323_s24 = smov (!%p168_p2), 8   ;;  %vm673_vm8 = vcmask (!%p168_p2), 228352   ;;  %vm682_vm9 = vcmask (!%p168_p2), 261120   ;;  %vm715_vm10 = vcmask (!%p168_p2), 293888   ;;  %vm805_vm11 = vcmask (!%p168_p2), 60416  }
   0x8   : > { %s1324_s29 = smov (!%p168_p2), 20   ;;  %s1325_s30 = smov (!%p168_p2), 24   ;;  %vm904_vm12 = vcmask (!%p168_p2), 130112   ;;  %vm955_vm13 = vcmask (!%p168_p2), 1040384   ;;  %vm958_vm14 = vcmask (!%p168_p2), 1042432  }
   0x9   : > { %s1326_s5 = smov (!%p168_p2), 28   ;;  %s1327_s8 = smov (!%p168_p2), 32  }
   0xa   : > { %s1328_s13 = smov (!%p168_p2), 120  }
   0xd   : > { %s1757_s16 = smov (!%p202_p3, %s1080_s16), 1 }
   0xe   : > { %s1131_s17 = smul.u32 288, %s1757_s16  ;;  %s1100_s9 = sshll.u32 %s1757_s16, 5 }
   0xf   : > { %s1652_s12 = scalar_lea.vmem %s1753_s2, %s1100_s9  ;;  %s1101_s14 = sshll.u32 %s1757_s16, 6 }
  0x10   : > { %s1368_s20 = scalar_lea.vmem %s1751_s0, %s1131_s17  ;;  %s216_s19 = scalar_lea.vmem %s1754_s3, %s1101_s14 }
  0x11   : > { %v1371_v0 = vld [vmem:[%s1368_s20 + $0xa0] ss:$8 sps:$4 sm:$0xff]   ;;  %v249_v8 = vld [vmem:[%s1368_s20 + $0x90] ss:$8 sps:$4 sm:$0xff]   ;;  %v223_v14 = vld [vmem:[%s1368_s20 + $0x4] sm:$0x1] }
  0x12   : > { %v1374_v1 = vld [vmem:[%s1368_s20 + $0x48] ss:$8 sps:$4 sm:$0xff]   ;;  %v304_v3 = vunpack.c.l.bf16 %v1371_v0  ;;  %v306_v4 = vunpack.c.h.bf16 %v1371_v0  ;;  %v1382_v7 = vld [vmem:[%s1368_s20 + $0x58] ss:$8 sps:$4 sm:$0xff]   ;;  %v225_v15 = vld [vmem:[%s1368_s20 + $0xc] sm:$0x1]  ;;  %v300_v21 = vunpack.c.l.bf16 %v249_v8  ;;  %v302_v22 = vunpack.c.h.bf16 %v249_v8 }
  0x13   : > { %v267_v2 = vld [vmem:[%s1368_s20 + $0xe8] ss:$8 sps:$4 sm:$0xff]   ;;  %v291_v5 = vunpack.c.l.bf16 %v1374_v1  ;;  %v292_v6 = vunpack.c.h.bf16 %v1374_v1  ;;  %v293_v11 = vunpack.c.l.bf16 %v1382_v7  ;;  %v294_v12 = vunpack.c.h.bf16 %v1382_v7  ;;  %v265_v18 = vld [vmem:[%s1368_s20 + $0xd8] ss:$8 sps:$4 sm:$0xff]   ;;  %v227_v28 = vld [vmem:[%s1368_s20 + $0x14] sm:$0x1] }
  0x14   : > { %v318_v9 = vunpack.c.l.bf16 %v267_v2  ;;  %v319_v10 = vunpack.c.h.bf16 %v267_v2  ;;  %v1388_v13 = vld [vmem:[%s1368_s20] ss:$8 sps:$4 sm:$0xff]   ;;  %v1164_v16 = vpack.i.bf16 %v306_v4, %v304_v3  ;;  %v274_v24 = vunpack.c.l.bf16 %v223_v14  ;;  %v226_v27 = vld [vmem:[%s1368_s20 + $0x10] ss:$8 sps:$4 sm:$0xff]   ;;  %v229_v33 = vld [vmem:[%s1368_s20 + $0x1c] sm:$0x1] }
  0x15   : > { %v1149_v17 = vpack.i.bf16 %v292_v6, %v291_v5  ;;  %v1154_v20 = vpack.i.bf16 %v294_v12, %v293_v11  ;;  %v273_v23 = vunpack.c.l.bf16 %v1388_v13  ;;  %v1403_v25 = vunpack.c.h.bf16 %v1388_v13  ;;  %v250_v34 = vld [vmem:[%s1368_s20 + $0x94] sm:$0x1]  ;;  %v252_v43 = vld [vmem:[%s1368_s20 + $0x9c] sm:$0x1]  ;;  %v254_v48 = vld [vmem:[%s1368_s20 + $0xa4] sm:$0x1] }
  0x16   : > { %v1174_v19 = vpack.i.bf16 %v319_v10, %v318_v9  ;;  %1165 = vrot.lane.b32.xlu1 %v1164_v16, %s1320_s21  ;;  %v276_v26 = vunpack.c.l.bf16 %v225_v15  ;;  %v502_v29 = vrot.slane %v306_v4, 1  ;;  %v496_v30 = vrot.slane %v302_v22, 1  ;;  %v256_v49 = vld [vmem:[%s1368_s20 + $0xac] sm:$0x1]  ;;  %v230_v8 = vld [vmem:[%s1368_s20 + $0x20] ss:$72 sps:$4 sm:$0xff]  }
  0x17   : > { %1150 = vrot.lane.b32.xlu0 %v1149_v17, %s1321_s22  ;;  %v1159_v31 = vpack.i.bf16 %v302_v22, %v300_v21  ;;  %v316_v32 = vunpack.c.l.bf16 %v265_v18  ;;  %v373_v35 = vrot.slane %v273_v23, 1  ;;  %v374_v36 = vrot.slane %v274_v24, 1  ;;  %v1309_v15 = vld [vmem:[%s1752_s1] sm:$0xff]  }
  0x18   : > { %v376_v37 = vrot.slane %v1403_v25, 1  ;;  %v377_v38 = vrot.slane %v276_v26, 1  ;;  %v317_v39 = vunpack.c.h.bf16 %v265_v18  ;;  %v1412_v40 = vunpack.c.l.bf16 %v226_v27  ;;  %1109 = vmatprep.subr.bf16.mxu0 %v1309_v15  ;;  %1123 = vmatprep.subr.bf16.mxu1 %v1309_v15  ;;  %v1461_v26 = vld [vmem:[%s1368_s20 + $0x70] ss:$8 sps:$4 sm:$0xff]  }
  0x19   : > { %v278_v41 = vunpack.c.l.bf16 %v227_v28  ;;  %v1414_v42 = vunpack.c.h.bf16 %v226_v27  ;;  %v375_v44 = vsel %vm372_vm0, %v373_v35, %v374_v36  ;;  %v280_v46 = vunpack.c.l.bf16 %v229_v33  ;;  %1110 = vmatpush3.bf16.msra.mxu0 %v1309_v15  ;;  %1126 = vmatpush3.bf16.msra.mxu1 %v1309_v15  ;;  %v1464_v28 = vld [vmem:[%s1368_s20 + $0x28] ss:$88 sps:$4 sm:$0xff]  }
  0x1a   : > { %1175 = vrot.lane.b32.xlu1 %v1174_v19, %s1322_s23  ;;  %v1421_v45 = vsel %vm372_vm0, %v376_v37, %v377_v38  ;;  %v301_v47 = vunpack.c.l.bf16 %v250_v34  ;;  %v493_v50 = vrot.slane %v300_v21, 1  ;;  %v379_v52 = vrot.slane %v1412_v40, 1  ;;  %v231_v19 = vld [vmem:[%s1368_s20 + $0x24] sm:$0x1]  ;;  %v1310_v21 = vld [vmem:[%s1752_s1 + $0x8] sm:$0xff]  }
  0x1b   : > { %1155 = vrot.lane.b32.xlu0 %v1154_v20, %s1321_s22  ;;  %v1179_v51 = vpack.i.bf16 %v1421_v45, %v375_v44  ;;  %v380_v53 = vrot.slane %v278_v41, 1  ;;  %v382_v54 = vrot.slane %v1414_v42, 1  ;;  %v383_v55 = vrot.slane %v280_v46, 1  ;;  %1111 = vmatprep.subr.bf16.mxu0 %v1310_v21 }
  0x1c   : > { %v303_v56 = vunpack.c.l.bf16 %v252_v43  ;;  %v494_v57 = vrot.slane %v301_v47, 1  ;;  %v499_v58 = vrot.slane %v304_v3, 1  ;;  %v305_v60 = vunpack.c.l.bf16 %v254_v48  ;;  %1124 = vmatprep.subr.bf16.mxu1 %v1310_v21 }
  0x1d   : > { %v1429_v59 = vsel %vm372_vm0, %v379_v52, %v380_v53  ;;  %v307_v61 = vunpack.c.l.bf16 %v256_v49  ;;  %v1169_v62 = vpack.i.bf16 %v317_v39, %v316_v32  ;;  %v1434_v63 = vsel %vm372_vm0, %v382_v54, %v383_v55  ;;  %v237_v32 = vld [vmem:[%s1368_s20 + $0x3c] sm:$0x1]  ;;  %1112 = vmatpush3.bf16.msra.mxu0 %v1310_v21  ;;  %1127 = vmatpush3.bf16.msra.mxu1 %v1310_v21  ;;  %v257_v52 = vld [vmem:[%s1368_s20 + $0xb0] ss:$8 sps:$4 sm:$0xff]  }
  0x1e   : > { %1180 = vrot.lane.b32.xlu1 %v1179_v51, %s1323_s24  ;;  %v497_v0 = vrot.slane %v303_v56, 1  ;;  %v1184_v2 = vpack.i.bf16 %v1434_v63, %v1429_v59  ;;  %v495_v3 = vsel %vm372_vm0, %v493_v50, %v494_v57  ;;  %v500_v4 = vrot.slane %v305_v60, 1  ;;  %v1311_v53 = vld [vmem:[%s1752_s1 + $0x10] ss:$0 sps:$4 sm:$0x33]  }
  0x1f   : > { %1160 = vrot.lane.b32.xlu0 %v1159_v31, %s1320_s21  ;;  %v503_v5 = vrot.slane %v307_v61, 1  ;;  %v1448_v18 = vunpack.c.l.bf16 %v230_v8  ;;  %v295_v20 = vunpack.c.h.bf16 %v230_v8  ;;  %v1199_v22 = vpack.i.bf16 %v1412_v40, %v1403_v25  ;;  %v235_v31 = vld [vmem:[%s1368_s20 + $0x34] sm:$0x1]  ;;  %v261_v56 = vld [vmem:[%s1368_s20 + $0xc0] ss:$8 sps:$4 sm:$0xff]   ;;  %1129 = vmatprep.subr.msk.bf16.mxu0 %vm728_vm1, %v1311_v53 }
  0x20   : > { %v498_v9 = vsel %vm372_vm0, %v496_v30, %v497_v0  ;;  %v501_v10 = vsel %vm372_vm0, %v499_v58, %v500_v4  ;;  %v282_v27 = vunpack.c.l.bf16 %v231_v19  ;;  %v234_v30 = vld [vmem:[%s1368_s20 + $0x30] ss:$8 sps:$4 sm:$0xff]   ;;  %v1209_v33 = vpack.i.bf16 %v293_v11, %v292_v6  ;;  %v258_v60 = vld [vmem:[%s1368_s20 + $0xb4] sm:$0x1]  ;;  %v260_v61 = vld [vmem:[%s1368_s20 + $0xbc] sm:$0x1]  ;;  %1130 = vmatprep.subr.msk.bf16.mxu1 %vm728_vm1, %v1311_v53 }
  0x21   : > { %v504_v14 = vsel %vm372_vm0, %v502_v29, %v503_v5  ;;  %v1189_v16 = vpack.i.bf16 %v498_v9, %v495_v3  ;;  %v1204_v24 = vpack.i.bf16 %v1448_v18, %v1414_v42  ;;  %v233_v29 = vld [vmem:[%s1368_s20 + $0x2c] sm:$0x1]  ;;  %v1214_v34 = vpack.i.bf16 %v295_v20, %v294_v12 }
  0x22   : > { %1185 = vrot.lane.b32.xlu1 %v1184_v2, %s1323_s24  ;;  %v1194_v17 = vpack.i.bf16 %v504_v14, %v501_v10  ;;  %v296_v35 = vunpack.c.l.bf16 %v1461_v26  ;;  %v385_v36 = vrot.slane %v1448_v18, 1  ;;  %v386_v37 = vrot.slane %v282_v27, 1  ;;  %v264_v0 = vld [vmem:[%s1368_s20 + $0xcc] sm:$0x1]  ;;  %v269_v10 = vld [vmem:[%s1368_s20 + $0xf8] ss:$8 sps:$4 sm:$0xff]  }
  0x23   : > { %1170 = vrot.lane.b32.xlu0 %v1169_v62, %s1322_s23  ;;  %v1481_v38 = vunpack.c.l.bf16 %v1464_v28  ;;  %v284_v1 = vunpack.c.l.bf16 %v233_v29  ;;  %v1483_v39 = vunpack.c.l.bf16 %v234_v30  ;;  %v286_v6 = vunpack.c.l.bf16 %v235_v31  ;;  %v271_v14 = vld [vmem:[%s1368_s20 + $0x108] ss:$8 sps:$4 sm:$0xff]  }
  0x24   : > { %v1485_v11 = vunpack.c.h.bf16 %v234_v30  ;;  %v288_v7 = vunpack.c.l.bf16 %v237_v32  ;;  %v1219_v12 = vpack.i.bf16 %v1429_v59, %v1421_v45  ;;  %v1224_v41 = vpack.i.bf16 %v296_v35, %v295_v20 }
  0x25   : > { %v297_v43 = vunpack.c.h.bf16 %v1461_v26  ;;  %v387_v44 = vsel %vm372_vm0, %v385_v36, %v386_v37  ;;  %v298_v46 = vunpack.c.h.bf16 %v1464_v28  ;;  %v388_v47 = vrot.slane %v1481_v38, 1 }
  0x26   : > { %1195 = vrot.lane.b32.xlu1 %v1194_v17, %s1324_s29  ;;  %v389_v48 = vrot.slane %v284_v1, 1  ;;  %v391_v45 = vrot.slane %v1483_v39, 1  ;;  %v392_v49 = vrot.slane %v286_v6, 1  ;;  %v394_v50 = vrot.slane %v1485_v11, 1 }
  0x27   : > { %1190 = vrot.lane.b32.xlu0 %v1189_v16, %s1324_s29  ;;  %v395_v51 = vrot.slane %v288_v7, 1  ;;  %v1229_v54 = vpack.i.bf16 %v387_v44, %v1434_v63  ;;  %v1234_v55 = vpack.i.bf16 %v298_v46, %v297_v43  ;;  %v308_v62 = vunpack.c.l.bf16 %v257_v52  ;;  %v262_v63 = vld [vmem:[%s1368_s20 + $0xc4] sm:$0x1] }
  0x28   : > { %v1512_v57 = vsel %vm372_vm0, %v388_v47, %v389_v48  ;;  %v1515_v58 = vsel %vm372_vm0, %v391_v45, %v392_v49  ;;  %v310_v2 = vunpack.c.h.bf16 %v257_v52  ;;  %v312_v3 = vunpack.c.l.bf16 %v261_v56  ;;  %v238_v48 = vld [vmem:[%s1368_s20 + $0x40] ss:$72 sps:$4 sm:$0xff]   ;;  %v239_v45 = vld [vmem:[%s1368_s20 + $0x44] sm:$0x1]  ;;  %s1090_s20 = sshll.u32 %s1757_s16, 2 }
  0x29   : > { %v1518_v59 = vsel %vm372_vm0, %v394_v50, %v395_v51  ;;  %v314_v4 = vunpack.c.h.bf16 %v261_v56  ;;  %v730_v5 = vsel %vm728_vm1, %v1311_v53, 0  ;;  %v1239_v8 = vpack.i.bf16 %v1512_v57, %v387_v44 }
  0x2a   : > { %1205 = vrot.lane.b32.xlu1 %v1204_v24, %s1325_s30  ;;  %v1244_v9 = vpack.i.bf16 %v1518_v59, %v1515_v58  ;;  %v309_v15 = vunpack.c.l.bf16 %v258_v60  ;;  %v311_v16 = vunpack.c.l.bf16 %v260_v61  ;;  %v313_v17 = vunpack.c.l.bf16 %v262_v63  ;;  %1114 = vmatpush3.bf16.msra.mxu0 %v730_v5 }
  0x2b   : > { %1200 = vrot.lane.b32.xlu0 %v1199_v22, %s1325_s30  ;;  %v315_v19 = vunpack.c.l.bf16 %v264_v0  ;;  %1128 = vmatpush3.bf16.msra.mxu1 %v730_v5  ;;  %v508_v20 = vrot.slane %v310_v2, 1  ;;  %v505_v21 = vrot.slane %v308_v62, 1  ;;  %v1249_v22 = vpack.i.bf16 %v310_v2, %v308_v62 }
  0x2c   : > { %v514_v24 = vrot.slane %v314_v4, 1  ;;  %v1254_v27 = vpack.i.bf16 %v314_v4, %v312_v3  ;;  %v511_v29 = vrot.slane %v312_v3, 1  ;;  %v320_v30 = vunpack.c.l.bf16 %v269_v10 }
  0x2d   : > { %v321_v31 = vunpack.c.h.bf16 %v269_v10  ;;  %v322_v32 = vunpack.c.l.bf16 %v271_v14  ;;  %v509_v36 = vrot.slane %v311_v16, 1  ;;  %v512_v37 = vrot.slane %v313_v17, 1 }
  0x2e   : > { %1215 = vrot.lane.b32.xlu1 %v1214_v34, %s1326_s5  ;;  %v506_v34 = vrot.slane %v309_v15, 1  ;;  %v515_v1 = vrot.slane %v315_v19, 1  ;;  %v289_v51 = vunpack.c.l.bf16 %v238_v48  ;;  %v290_v52 = vunpack.c.l.bf16 %v239_v45 }
  0x2f   : > { %1210 = vrot.lane.b32.xlu0 %v1209_v33, %s1326_s5  ;;  %v323_v33 = vunpack.c.h.bf16 %v271_v14  ;;  %v1259_v6 = vpack.i.bf16 %v321_v31, %v320_v30  ;;  %v513_v44 = vsel %vm372_vm0, %v511_v29, %v512_v37  ;;  %v1279_v53 = vpack.i.bf16 %v1483_v39, %v1481_v38 }
  0x30   : > { %v516_v47 = vsel %vm372_vm0, %v514_v24, %v515_v1  ;;  %v592_v56 = vrot.slane %v289_v51, 1  ;;  %v593_v60 = vrot.slane %v290_v52, 1  ;;  %v1289_v61 = vpack.i.bf16 %v297_v43, %v296_v35 }
  0x31   : > { %v1264_v7 = vpack.i.bf16 %v323_v33, %v322_v32  ;;  %v1274_v50 = vpack.i.bf16 %v516_v47, %v513_v44  ;;  %v1299_v0 = vpack.i.bf16 %v1515_v58, %v1512_v57 }
  0x32   : > { %1225 = vrot.lane.b32.xlu1 %v1224_v41, %s1321_s22  ;;  %v510_v41 = vsel %vm372_vm0, %v508_v20, %v509_v36  ;;  %v594_v63 = vsel %vm372_vm0, %v592_v56, %v593_v60 }
  0x33   : > { %1220 = vrot.lane.b32.xlu0 %v1219_v12, %s1327_s8  ;;  %v507_v12 = vsel %vm372_vm0, %v505_v21, %v506_v34  ;;  %v1304_v2 = vpack.i.bf16 %v594_v63, %v1518_v59 }
  0x34   : > { %v1269_v49 = vpack.i.bf16 %v510_v41, %v507_v12 }
  0x36   : > { %1235 = vrot.lane.b32.xlu1 %v1234_v55, %s1321_s22  ;;  %v299_v55 = vunpack.c.h.bf16 %v238_v48 }
  0x37   : > { %1230 = vrot.lane.b32.xlu0 %v1229_v54, %s1327_s8  ;;  %v1284_v54 = vpack.i.bf16 %v289_v51, %v1485_v11 }
  0x38   : > { %v1294_v62 = vpack.i.bf16 %v299_v55, %v298_v46 }
  0x3a   : > { %1245 = vrot.lane.b32.xlu1 %v1244_v9, %s1323_s24 }
  0x3b   : > { %1240 = vrot.lane.b32.xlu0 %v1239_v8, %s1323_s24 }
  0x3e   : > { %1255 = vrot.lane.b32.xlu1 %v1254_v27, %s1320_s21 }
  0x3f   : > { %1250 = vrot.lane.b32.xlu0 %v1249_v22, %s1320_s21 }
  0x42   : > { %1265 = vrot.lane.b32.xlu1 %v1264_v7, %s1322_s23 }
  0x43   : > { %1260 = vrot.lane.b32.xlu0 %v1259_v6, %s1322_s23  ;;  %s220_s23 = scalar_lea.vmem %s1755_s4, %s1090_s20 }
  0x46   : > { %1275 = vrot.lane.b32.xlu1 %v1274_v50, %s1324_s29 }
  0x47   : > { %1270 = vrot.lane.b32.xlu0 %v1269_v49, %s1324_s29 }
  0x4a   : > { %1285 = vrot.lane.b32.xlu1 %v1284_v54, %s1325_s30 }
  0x4b   : > { %1280 = vrot.lane.b32.xlu0 %v1279_v53, %s1325_s30 }
  0x4e   : > { %1295 = vrot.lane.b32.xlu1 %v1294_v62, %s1326_s5 }
  0x4f   : > { %1290 = vrot.lane.b32.xlu0 %v1289_v61, %s1326_s5 }
  0x52   : > { %1305 = vrot.lane.b32.xlu1 %v1304_v2, %s1327_s8 }
  0x53   : > { %1300 = vrot.lane.b32.xlu0 %v1299_v0, %s1327_s8 }
  0x88   : > { %v1166_v26 = vpop.permute.xlu1 %1165 }
  0x89   : > { %v1151_v35 = vpop.permute.xlu0 %1150  ;;  %v1168_v19 = vunpack.i.h.bf16 %v1166_v26  ;;  %v1167_v20 = vunpack.i.l.bf16 %v1166_v26 }
  0x8a   : > { %v1153_v8 = vunpack.i.h.bf16 %v1151_v35  ;;  %v1152_v9 = vunpack.i.l.bf16 %v1151_v35 }
  0x8c   : > { %v1176_v43 = vpop.permute.xlu1 %1175  ;;  %v620_v21 = vsel %vm619_vm2, %v273_v23, %v1152_v9  ;;  %v621_v22 = vsel %vm619_vm2, %v1403_v25, %v1153_v8 }
  0x8d   : > { %v1156_v28 = vpop.permute.xlu0 %1155  ;;  %v1178_v37 = vunpack.i.h.bf16 %v1176_v43  ;;  %v1177_v1 = vunpack.i.l.bf16 %v1176_v43 }
  0x8e   : > { %v1158_v10 = vunpack.i.h.bf16 %v1156_v28  ;;  %v1157_v14 = vunpack.i.l.bf16 %v1156_v28 }
  0x90   : > { %v1181_v3 = vpop.permute.xlu1 %1180  ;;  %v622_v24 = vsel %vm619_vm2, %v1412_v40, %v1157_v14  ;;  %v623_v27 = vsel %vm619_vm2, %v1414_v42, %v1158_v10 }
  0x91   : > { %v1161_v46 = vpop.permute.xlu0 %1160  ;;  %v1183_v16 = vunpack.i.h.bf16 %v1181_v3  ;;  %v1182_v17 = vunpack.i.l.bf16 %v1181_v3 }
  0x92   : > { %v1163_v31 = vunpack.i.h.bf16 %v1161_v46  ;;  %v1162_v32 = vunpack.i.l.bf16 %v1161_v46 }
  0x93   : > { %v630_v13 = vsel %vm628_vm3, %v621_v22, %v1183_v16  ;;  %v629_v23 = vsel %vm628_vm3, %v620_v21, %v1182_v17 }
  0x94   : > { %v1186_v5 = vpop.permute.xlu1 %1185  ;;  %v638_v44 = vsel %vm637_vm4, %v629_v23, %v1162_v32  ;;  %v639_v47 = vsel %vm637_vm4, %v630_v13, %v1163_v31 }
  0x95   : > { %v1171_v4 = vpop.permute.xlu0 %1170  ;;  %v1188_v58 = vunpack.i.h.bf16 %v1186_v5  ;;  %v1187_v59 = vunpack.i.l.bf16 %v1186_v5 }
  0x96   : > { %v1173_v36 = vunpack.i.h.bf16 %v1171_v4  ;;  %v1172_v25 = vunpack.i.l.bf16 %v1171_v4 }
  0x97   : > { %v632_v33 = vsel %vm628_vm3, %v623_v27, %v1188_v58  ;;  %v631_v34 = vsel %vm628_vm3, %v622_v24, %v1187_v59 }
  0x98   : > { %v1567_v57 = vpop.permute.xlu1 %1195  ;;  %v641_v40 = vsel %vm637_vm4, %v632_v33, %v1168_v19  ;;  %v640_v42 = vsel %vm637_vm4, %v631_v34, %v1167_v20  ;;  %v647_v49 = vsel %vm646_vm5, %v638_v44, %v1172_v25  ;;  %v648_v50 = vsel %vm646_vm5, %v639_v47, %v1173_v36 }
  0x99   : > { %v1191_v15 = vpop.permute.xlu0 %1190  ;;  %v1198_v53 = vunpack.i.h.bf16 %v1567_v57  ;;  %v1197_v54 = vunpack.i.l.bf16 %v1567_v57  ;;  %v649_v55 = vsel %vm646_vm5, %v640_v42, %v1177_v1  ;;  %v650_v56 = vsel %vm646_vm5, %v641_v40, %v1178_v37 }
  0x9a   : > { %v1193_v6 = vunpack.i.h.bf16 %v1191_v15  ;;  %v1192_v7 = vunpack.i.l.bf16 %v1191_v15 }
  0x9b   : > { %v658_v10 = vsel %vm655_vm6, %v649_v55, %v1197_v54  ;;  %v659_v14 = vsel %vm655_vm6, %v650_v56, %v1198_v53 }
  0x9c   : > { %v1206_v30 = vpop.permute.xlu1 %1205  ;;  %v656_v60 = vsel %vm655_vm6, %v647_v49, %v1192_v7  ;;  %v657_v61 = vsel %vm655_vm6, %v648_v50, %v1193_v6 }
  0x9d   : > { %v1201_v29 = vpop.permute.xlu0 %1200  ;;  %v1208_v62 = vunpack.i.h.bf16 %v1206_v30  ;;  %v1207_v63 = vunpack.i.l.bf16 %v1206_v30 }
  0x9e   : > { %v1203_v48 = vunpack.i.h.bf16 %v1201_v29  ;;  %v1202_v45 = vunpack.i.l.bf16 %v1201_v29 }
  0x9f   : > { %v667_v59 = vsel %vm664_vm7, %v658_v10, %v1207_v63  ;;  %v668_v16 = vsel %vm664_vm7, %v659_v14, %v1208_v62 }
  0xa0   : > { %v1216_v41 = vpop.permute.xlu1 %1215  ;;  %v665_v26 = vsel %vm664_vm7, %v656_v60, %v1202_v45  ;;  %v666_v35 = vsel %vm664_vm7, %v657_v61, %v1203_v48 }
  0xa1   : > { %v1211_v12 = vpop.permute.xlu0 %1210  ;;  %v1218_v46 = vunpack.i.h.bf16 %v1216_v41  ;;  %v1217_v3 = vunpack.i.l.bf16 %v1216_v41 }
  0xa2   : > { %v1213_v51 = vunpack.i.h.bf16 %v1211_v12  ;;  %v1212_v52 = vunpack.i.l.bf16 %v1211_v12 }
  0xa3   : > { %v676_v20 = vsel %vm673_vm8, %v667_v59, %v1217_v3  ;;  %v677_v21 = vsel %vm673_vm8, %v668_v16, %v1218_v46 }
  0xa4   : > { %v1226_v2 = vpop.permute.xlu1 %1225  ;;  %v674_v4 = vsel %vm673_vm8, %v665_v26, %v1212_v52  ;;  %v675_v5 = vsel %vm673_vm8, %v666_v35, %v1213_v51 }
  0xa5   : > { %v1221_v0 = vpop.permute.xlu0 %1220  ;;  %v1228_v13 = vunpack.i.h.bf16 %v1226_v2  ;;  %v1227_v23 = vunpack.i.l.bf16 %v1226_v2 }
  0xa6   : > { %v1223_v43 = vunpack.i.h.bf16 %v1221_v0  ;;  %v1222_v28 = vunpack.i.l.bf16 %v1221_v0 }
  0xa7   : > { %v625_v48 = vsel %vm619_vm2, %v1481_v38, %v1228_v13  ;;  %v624_v45 = vsel %vm619_vm2, %v1448_v18, %v1227_v23 }
  0xa8   : > { %v683_v8 = vsel %vm682_vm9, %v674_v4, %v1222_v28  ;;  %v684_v9 = vsel %vm682_vm9, %v675_v5, %v1223_v43  ;;  %v1236_v57 = vpop.permute.xlu1 %1235 }
  0xa9   : > { %v1231_v15 = vpop.permute.xlu0 %1230  ;;  %v691_v58 = vpack.c.bf16 %v684_v9, %v683_v8  ;;  %v1238_v36 = vunpack.i.h.bf16 %v1236_v57  ;;  %v1237_v25 = vunpack.i.l.bf16 %v1236_v57 }
  0xaa   : > { %v1233_v17 = vunpack.i.h.bf16 %v1231_v15  ;;  %v1232_v19 = vunpack.i.l.bf16 %v1231_v15 }
  0xab   : > { %1115 = vmatprep.mubr.msk.bf16.mxu0 %vm715_vm10, %v691_v58  ;;  %v627_v49 = vsel %vm619_vm2, %v1485_v11, %v1238_v36  ;;  %v626_v50 = vsel %vm619_vm2, %v1483_v39, %v1237_v25 }
  0xac   : > { %v685_v22 = vsel %vm682_vm9, %v676_v20, %v1232_v19  ;;  %v686_v24 = vsel %vm682_vm9, %v677_v21, %v1233_v17  ;;  %v1246_v30 = vpop.permute.xlu1 %1245 }
  0xad   : > { %v692_v27 = vpack.c.bf16 %v686_v24, %v685_v22  ;;  %v1241_v29 = vpop.permute.xlu0 %1240  ;;  %v1248_v40 = vunpack.i.h.bf16 %v1246_v30  ;;  %v1247_v42 = vunpack.i.l.bf16 %v1246_v30 }
  0xae   : > { %v1243_v37 = vunpack.i.h.bf16 %v1241_v29  ;;  %v1242_v1 = vunpack.i.l.bf16 %v1241_v29 }
  0xaf   : > { %1116 = vmatmul.mubr.msk.bf16.vlgmr.msra.gmra.mrb[0].mxu0 %vm715_vm10, %v692_v27  ;;  %v635_v53 = vsel %vm628_vm3, %v626_v50, %v1247_v42  ;;  %v636_v54 = vsel %vm628_vm3, %v627_v49, %v1248_v40 }
  0xb0   : > { %v1256_v32 = vpop.permute.xlu1 %1255  ;;  %v633_v51 = vsel %vm628_vm3, %v624_v45, %v1242_v1  ;;  %v634_v52 = vsel %vm628_vm3, %v625_v48, %v1243_v37 }
  0xb1   : > { %v1251_v31 = vpop.permute.xlu0 %1250  ;;  %v1258_v44 = vunpack.i.h.bf16 %v1256_v32  ;;  %v1257_v47 = vunpack.i.l.bf16 %v1256_v32 }
  0xb2   : > { %v1253_v12 = vunpack.i.h.bf16 %v1251_v31  ;;  %v1252_v41 = vunpack.i.l.bf16 %v1251_v31 }
  0xb3   : > { %v644_v39 = vsel %vm637_vm4, %v635_v53, %v1257_v47  ;;  %v645_v63 = vsel %vm637_vm4, %v636_v54, %v1258_v44 }
  0xb4   : > { %v1266_v34 = vpop.permute.xlu1 %1265  ;;  %v642_v62 = vsel %vm637_vm4, %v633_v51, %v1252_v41  ;;  %v643_v11 = vsel %vm637_vm4, %v634_v52, %v1253_v12 }
  0xb5   : > { %v1261_v33 = vpop.permute.xlu0 %1260  ;;  %v1268_v61 = vunpack.i.h.bf16 %v1266_v34  ;;  %v1267_v18 = vunpack.i.l.bf16 %v1266_v34 }
  0xb6   : > { %v1263_v38 = vunpack.i.h.bf16 %v1261_v33  ;;  %v1262_v60 = vunpack.i.l.bf16 %v1261_v33 }
  0xb7   : > { %v653_v10 = vsel %vm646_vm5, %v644_v39, %v1267_v18  ;;  %v654_v14 = vsel %vm646_vm5, %v645_v63, %v1268_v61 }
  0xb8   : > { %v1276_v7 = vpop.permute.xlu1 %1275  ;;  %v651_v8 = vsel %vm646_vm5, %v642_v62, %v1262_v60  ;;  %v652_v9 = vsel %vm646_vm5, %v643_v11, %v1263_v38 }
  0xb9   : > { %v1271_v6 = vpop.permute.xlu0 %1270  ;;  %v1278_v26 = vunpack.i.h.bf16 %v1276_v7  ;;  %v1277_v35 = vunpack.i.l.bf16 %v1276_v7 }
  0xba   : > { %v1273_v0 = vunpack.i.h.bf16 %v1271_v6  ;;  %v1272_v2 = vunpack.i.l.bf16 %v1271_v6 }
  0xbb   : > { %v662_v19 = vsel %vm655_vm6, %v653_v10, %v1277_v35  ;;  %v663_v20 = vsel %vm655_vm6, %v654_v14, %v1278_v26 }
  0xbc   : > { %v1286_v56 = vpop.permute.xlu1 %1285  ;;  %v660_v16 = vsel %vm655_vm6, %v651_v8, %v1272_v2  ;;  %v661_v17 = vsel %vm655_vm6, %v652_v9, %v1273_v0 }
  0xbd   : > { %v1281_v55 = vpop.permute.xlu0 %1280  ;;  %v1288_v46 = vunpack.i.h.bf16 %v1286_v56  ;;  %v1287_v3 = vunpack.i.l.bf16 %v1286_v56 }
  0xbe   : > { %v1283_v43 = vunpack.i.h.bf16 %v1281_v55  ;;  %v1282_v28 = vunpack.i.l.bf16 %v1281_v55 }
  0xbf   : > { %v671_v24 = vsel %vm664_vm7, %v662_v19, %v1287_v3  ;;  %v672_v27 = vsel %vm664_vm7, %v663_v20, %v1288_v46 }
  0xc0   : > { %v1296_v5 = vpop.permute.xlu1 %1295  ;;  %v669_v21 = vsel %vm664_vm7, %v660_v16, %v1282_v28  ;;  %v670_v22 = vsel %vm664_vm7, %v661_v17, %v1283_v43 }
  0xc1   : > { %v1291_v4 = vpop.permute.xlu0 %1290  ;;  %v1298_v58 = vunpack.i.h.bf16 %v1296_v5  ;;  %v1297_v59 = vunpack.i.l.bf16 %v1296_v5 }
  0xc2   : > { %v1293_v15 = vunpack.i.h.bf16 %v1291_v4  ;;  %v1292_v57 = vunpack.i.l.bf16 %v1291_v4 }
  0xc3   : > { %v680_v13 = vsel %vm673_vm8, %v671_v24, %v1297_v59  ;;  %v681_v23 = vsel %vm673_vm8, %v672_v27, %v1298_v58 }
  0xc4   : > { %v1306_v30 = vpop.permute.xlu1 %1305  ;;  %v678_v36 = vsel %vm673_vm8, %v669_v21, %v1292_v57  ;;  %v679_v25 = vsel %vm673_vm8, %v670_v22, %v1293_v15 }
  0xc5   : > { %v1301_v29 = vpop.permute.xlu0 %1300  ;;  %v1308_v33 = vunpack.i.h.bf16 %v1306_v30  ;;  %v1307_v34 = vunpack.i.l.bf16 %v1306_v30 }
  0xc6   : > { %v1303_v31 = vunpack.i.h.bf16 %v1301_v29  ;;  %v1302_v32 = vunpack.i.l.bf16 %v1301_v29 }
  0xc7   : > { %v689_v37 = vsel %vm682_vm9, %v680_v13, %v1307_v34  ;;  %v690_v1 = vsel %vm682_vm9, %v681_v23, %v1308_v33 }
  0xc8   : > { %v687_v40 = vsel %vm682_vm9, %v678_v36, %v1302_v32  ;;  %v688_v42 = vsel %vm682_vm9, %v679_v25, %v1303_v31  ;;  %v694_v6 = vpack.c.bf16 %v690_v1, %v689_v37 }
  0xc9   : > { %v693_v7 = vpack.c.bf16 %v688_v42, %v687_v40 }
  0xcb   : > { %1119 = vmatprep.mubr.msk.bf16.mxu1 %vm715_vm10, %v693_v7 }
  0xcc   : > { %1120 = vmatmul.mubr.msk.bf16.vlgmr.msra.gmra.mrb[0].mxu1 %vm715_vm10, %v694_v6 }
 0x182   : > { %v1117_v12 = vpop.f32.mrb[0].mxu0 }
 0x183   : > { %v799_v41 = vpack.c.bf16 %v1117_v12, %v1117_v12  ;;  %826 = vrot.lane.b32.xlu0 %v1117_v12, %s1328_s13  ;;  %v766_v44 = vpop.f32.mrb[1].mxu0  ;;  %v857_v49 = vsel %vm628_vm3, %v1117_v12, 0.0  ;;  %v877_v52 = vmul.f32 %v1117_v12, %v1117_v12  ;;  %v908_v18 = vsel %vm904_vm12, %v1117_v12, 0.0 }
 0x184   : > { %v797_v47 = vpack.c.bf16 %v766_v44, %v766_v44  ;;  %v875_v48 = vmul.f32 %v766_v44, %v766_v44  ;;  %v1118_v45 = vpop.f32.mrb[2].mxu0  ;;  %v854_v54 = vsel %vm628_vm3, %v766_v44, 0.0  ;;  %v905_v60 = vsel %vm904_vm12, %v766_v44, 0.0 }
 0x185   : > { %808 = vst.msk [vmem:[%s1652_s12 + $0x8] sm:$0xf] %vm805_vm11, %v799_v41  ;;  %v800_v50 = vpack.c.bf16 %v1118_v45, %v1118_v45  ;;  %828 = vrot.lane.b32.xlu1 %v1118_v45, %s1328_s13  ;;  %v769_v51 = vpop.f32.mrb[3].mxu0  ;;  %v878_v62 = vmul.f32 %v1118_v45, %v1118_v45  ;;  %v859_v35 = vsel %vm628_vm3, %v1118_v45, 0.0  ;;  %v886_v3 = vsel %vm628_vm3, %v877_v52, 0.0 }
 0x186   : > { %806 = vst.msk [vmem:[%s1652_s12] sm:$0xf] %vm805_vm11, %v797_v47  ;;  %v798_v53 = vpack.c.bf16 %v769_v51, %v769_v51  ;;  %v855_v55 = vsel %vm628_vm3, %v769_v51, 0.0  ;;  %v876_v38 = vmul.f32 %v769_v51, %v769_v51  ;;  %v906_v61 = vsel %vm904_vm12, %v769_v51, 0.0 }
 0x187   : > { %809 = vst.msk [vmem:[%s1652_s12 + $0xc] sm:$0xf] %vm805_vm11, %v800_v50  ;;  %v856_v56 = vadd.f32 %v855_v55, %v854_v54  ;;  %822 = vrot.lane.b32.xlu0 %v766_v44, %s1328_s13  ;;  %v883_v11 = vsel %vm628_vm3, %v875_v48, 0.0  ;;  %v907_v39 = vadd.f32 %v906_v61, %v905_v60  ;;  %v926_v2 = vsel %vm904_vm12, %v875_v48, 0.0 }
 0x188   : > { %807 = vst.msk [vmem:[%s1652_s12 + $0x4] sm:$0xf] %vm805_vm11, %v798_v53  ;;  %v884_v0 = vsel %vm628_vm3, %v876_v38, 0.0  ;;  %v927_v26 = vsel %vm904_vm12, %v876_v38, 0.0  ;;  %v929_v4 = vsel %vm904_vm12, %v877_v52, 0.0  ;;  %v910_v5 = vsel %vm904_vm12, %v1118_v45, 0.0 }
 0x189   : > { %v858_v63 = vadd.f32 %v857_v49, %v856_v56  ;;  %824 = vrot.lane.b32.xlu1 %v769_v51, %s1328_s13  ;;  %v885_v43 = vadd.f32 %v884_v0, %v883_v11  ;;  %v909_v28 = vadd.f32 %v908_v18, %v907_v39  ;;  %v928_v46 = vadd.f32 %v927_v26, %v926_v2 }
 0x18a   : > { %v888_v15 = vsel %vm628_vm3, %v878_v62, 0.0  ;;  %v931_v57 = vsel %vm904_vm12, %v878_v62, 0.0 }
 0x18b   : > { %v860_v8 = vadd.f32 %v859_v35, %v858_v63  ;;  %v887_v9 = vadd.f32 %v886_v3, %v885_v43  ;;  %v930_v10 = vadd.f32 %v929_v4, %v928_v46  ;;  %v911_v14 = vadd.f32 %v910_v5, %v909_v28 }
 0x18d   : > { %v889_v58 = vadd.f32 %v888_v15, %v887_v9  ;;  %v932_v59 = vadd.f32 %v931_v57, %v930_v10 }
 0x19f   : > { %v1682_v16 = vpop.f32.mrb[0].mxu1 }
 0x1a0   : > { %v803_v17 = vpack.c.bf16 %v1682_v16, %v1682_v16  ;;  %v782_v19 = vpop.f32.mrb[1].mxu1  ;;  %v881_v31 = vmul.f32 %v1682_v16, %v1682_v16  ;;  %v865_v12 = vsel %vm628_vm3, %v1682_v16, 0.0  ;;  %v916_v45 = vsel %vm904_vm12, %v1682_v16, 0.0 }
 0x1a1   : > { %v801_v20 = vpack.c.bf16 %v782_v19, %v782_v19  ;;  %v861_v21 = vsel %vm628_vm3, %v782_v19, 0.0  ;;  %v879_v22 = vmul.f32 %v782_v19, %v782_v19  ;;  %v1687_v24 = vpop.f32.mrb[2].mxu1  ;;  %830 = vrot.lane.b32.xlu0 %v782_v19, %s1328_s13  ;;  %v912_v27 = vsel %vm904_vm12, %v782_v19, 0.0 }
 0x1a2   : > { %812 = vst.msk [vmem:[%s1652_s12 + $0x18] sm:$0xf] %vm805_vm11, %v803_v17  ;;  %v804_v29 = vpack.c.bf16 %v1687_v24, %v1687_v24  ;;  %v785_v30 = vpop.f32.mrb[3].mxu1  ;;  %v862_v13 = vadd.f32 %v861_v21, %v860_v8  ;;  %v882_v25 = vmul.f32 %v1687_v24, %v1687_v24  ;;  %v913_v1 = vadd.f32 %v912_v27, %v911_v14 }
 0x1a3   : > { %810 = vst.msk [vmem:[%s1652_s12 + $0x10] sm:$0xf] %vm805_vm11, %v801_v20  ;;  %v890_v32 = vsel %vm628_vm3, %v879_v22, 0.0  ;;  %v933_v33 = vsel %vm904_vm12, %v879_v22, 0.0  ;;  %832 = vrot.lane.b32.xlu1 %v785_v30, %s1328_s13  ;;  %v802_v34 = vpack.c.bf16 %v785_v30, %v785_v30  ;;  %v863_v23 = vsel %vm628_vm3, %v785_v30, 0.0 }
 0x1a4   : > { %813 = vst.msk [vmem:[%s1652_s12 + $0x1c] sm:$0xf] %vm805_vm11, %v804_v29  ;;  %v880_v36 = vmul.f32 %v785_v30, %v785_v30  ;;  %v891_v37 = vadd.f32 %v890_v32, %v889_v58  ;;  %v864_v40 = vadd.f32 %v863_v23, %v862_v13  ;;  %v914_v6 = vsel %vm904_vm12, %v785_v30, 0.0 }
 0x1a5   : > { %811 = vst.msk [vmem:[%s1652_s12 + $0x14] sm:$0xf] %vm805_vm11, %v802_v34  ;;  %v934_v7 = vadd.f32 %v933_v33, %v932_v59  ;;  %v915_v44 = vadd.f32 %v914_v6, %v913_v1  ;;  %v894_v48 = vsel %vm628_vm3, %v881_v31, 0.0  ;;  %v937_v51 = vsel %vm904_vm12, %v881_v31, 0.0 }
 0x1a6   : > { %v892_v42 = vsel %vm628_vm3, %v880_v36, 0.0  ;;  %v935_v47 = vsel %vm904_vm12, %v880_v36, 0.0  ;;  %v866_v49 = vadd.f32 %v865_v12, %v864_v40  ;;  %v867_v52 = vsel %vm628_vm3, %v1687_v24, 0.0 }
 0x1a7   : > { %v893_v41 = vadd.f32 %v892_v42, %v891_v37  ;;  %v936_v50 = vadd.f32 %v935_v47, %v934_v7  ;;  %v917_v54 = vadd.f32 %v916_v45, %v915_v44  ;;  %v896_v55 = vsel %vm628_vm3, %v882_v25, 0.0 }
 0x1a8   : > { %v918_v56 = vsel %vm904_vm12, %v1687_v24, 0.0  ;;  %v868_v38 = vadd.f32 %v867_v52, %v866_v49  ;;  %v939_v61 = vsel %vm904_vm12, %v882_v25, 0.0 }
 0x1a9   : > { %v895_v53 = vadd.f32 %v894_v48, %v893_v41  ;;  %v938_v60 = vadd.f32 %v937_v51, %v936_v50  ;;  %v919_v62 = vadd.f32 %v918_v56, %v917_v54 }
 0x1aa   : > { %v869_v11 = vrot.slane %v868_v38, 4 }
 0x1ab   : > { %v897_v18 = vadd.f32 %v896_v55, %v895_v53  ;;  %v940_v39 = vadd.f32 %v939_v61, %v938_v60  ;;  %v920_v63 = vrot.slane %v919_v62, 4 }
 0x1ac   : > { %v870_v26 = vadd.f32 %v869_v11, %v868_v38 }
 0x1ad   : > { %v898_v0 = vrot.slane %v897_v18, 4  ;;  %v941_v2 = vrot.slane %v940_v39, 4  ;;  %v921_v35 = vadd.f32 %v920_v63, %v919_v62 }
 0x1ae   : > { %v871_v46 = vrot.slane %v870_v26, 2 }
 0x1af   : > { %v899_v43 = vadd.f32 %v898_v0, %v897_v18  ;;  %v942_v28 = vadd.f32 %v941_v2, %v940_v39  ;;  %v922_v3 = vrot.slane %v921_v35, 2 }
 0x1b0   : > { %v872_v8 = vadd.f32 %v871_v46, %v870_v26 }
 0x1b1   : > { %v900_v4 = vrot.slane %v899_v43, 2  ;;  %v943_v5 = vrot.slane %v942_v28, 2  ;;  %v923_v9 = vadd.f32 %v922_v3, %v921_v35 }
 0x1b2   : > { %v873_v15 = vrot.slane %v872_v8, 1 }
 0x1b3   : > { %v901_v10 = vadd.f32 %v900_v4, %v899_v43  ;;  %v944_v14 = vadd.f32 %v943_v5, %v942_v28  ;;  %v924_v57 = vrot.slane %v923_v9, 1 }
 0x1b4   : > { %v874_v19 = vadd.f32 %v873_v15, %v872_v8 }
 0x1b5   : > { %v902_v58 = vrot.slane %v901_v10, 1  ;;  %v945_v59 = vrot.slane %v944_v14, 1  ;;  %v925_v17 = vadd.f32 %v924_v57, %v923_v9 }
 0x1b7   : > { %v903_v20 = vadd.f32 %v902_v58, %v901_v10  ;;  %v946_v21 = vadd.f32 %v945_v59, %v944_v14  ;;  %948 = vrot.lane.b32.xlu0 %v925_v17, %s1328_s13 }
 0x1b9   : > { %v956_v22 = vsel %vm955_vm13, %v874_v19, %v903_v20  ;;  %952 = vrot.lane.b32.xlu1 %v946_v21, %s1328_s13 }
 0x1bb   : > { %834 = vrot.lane.b32.xlu0 %v1682_v16, %s1328_s13 }
 0x1bd   : > { %836 = vrot.lane.b32.xlu1 %v1687_v24, %s1328_s13 }
 0x1f5   : > { %v827_v27 = vpop.permute.xlu0 %826 }
 0x1f6   : > { %848 = vst.msk [vmem:[%s216_s19 + $0x10] sm:$0xff] %vm628_vm3, %v827_v27 }
 0x1f7   : > { %v829_v29 = vpop.permute.xlu1 %828 }
 0x1f8   : > { %849 = vst.msk [vmem:[%s216_s19 + $0x18] sm:$0xff] %vm628_vm3, %v829_v29 }
 0x1f9   : > { %v823_v30 = vpop.permute.xlu0 %822 }
 0x1fa   : > { %846 = vst.msk [vmem:[%s216_s19] sm:$0xff] %vm628_vm3, %v823_v30 }
 0x1fb   : > { %v825_v31 = vpop.permute.xlu1 %824 }
 0x1fc   : > { %847 = vst.msk [vmem:[%s216_s19 + $0x8] sm:$0xff] %vm628_vm3, %v825_v31 }
 0x213   : > { %v831_v16 = vpop.permute.xlu0 %830 }
 0x214   : > { %850 = vst.msk [vmem:[%s216_s19 + $0x20] sm:$0xff] %vm628_vm3, %v831_v16 }
 0x215   : > { %v833_v24 = vpop.permute.xlu1 %832 }
 0x216   : > { %851 = vst.msk [vmem:[%s216_s19 + $0x28] sm:$0xff] %vm628_vm3, %v833_v24 }
 0x229   : > { %v949_v32 = vpop.permute.xlu0 %948 }
 0x22a   : > { %v957_v33 = vsel %vm728_vm1, %v956_v22, %v949_v32 }
 0x22b   : > { %v953_v34 = vpop.permute.xlu1 %952 }
 0x22c   : > { %v959_v13 = vsel %vm958_vm14, %v957_v33, %v953_v34 }
 0x22d   : > { %960 = vst.msk [vmem:[%s220_s23] sm:$0xf] %vm805_vm11, %v959_v13  ;;  %v835_v23 = vpop.permute.xlu0 %834 }
 0x22e   : > { %852 = vst.msk [vmem:[%s216_s19 + $0x30] sm:$0xff] %vm628_vm3, %v835_v23 }
 0x22f   : > { %v837_v36 = vpop.permute.xlu1 %836 }
 0x230   : > { %853 = vst.msk [vmem:[%s216_s19 + $0x38] sm:$0xff] %vm628_vm3, %v837_v36 }
 0x231 PF: > { %s15_s15 = sadd.s32 1, %s1318_s15  }
 0x232   : > { %p12_p4 = scmp.ge.s32.totalorder %s15_s15, 4  }
 0x234   :  { %14 = sbr.rel (!%p12_p4) target bundleno = 1 (0x1), region = 82 }

</bundles_post_ra>
